<compile_context>
chip_gen: v5e
topology: v5e:2x2
jax: 0.10.0
libtpu: 0.0.40
codegen_flags: <defaults>
</compile_context>

<pallas_src>
import numpy as np
import jax
import jax.numpy as jnp
from jax.experimental import pallas as pl
from jax.experimental.pallas import tpu as pltpu

NEG_SLOPE = 0.01  # nn.LeakyReLU default negative_slope


def _leaky(v):
    return jnp.where(v > 0, v, NEG_SLOPE * v)


def _round_up(v, m):
    return ((v + m - 1) // m) * m


def chebgad_kernel(h_hbm_ref, b_ref,
                   wc1a_ref, wc1b_ref, bc1_ref,
                   wc2a_ref, wc2b_ref, bc2_ref,
                   wl3a_ref, wl3b_ref, bl3_ref,
                   out_ref,
                   h_scr, h0_scr, acc_scr, dma_sem):
    """Grid (relation r, stage s, row-tile m).
    Stage 0: h0 = conv1(h).  Stage 1: h1 = conv2(h0); h = linear3([h0, h1]); acc += h.
    Output = acc (sum over relations); leaky + linear4 are applied outside in XLA."""
    r = pl.program_id(0)
    s = pl.program_id(1)
    m = pl.program_id(2)
    tm = b_ref.shape[0]
    row = pl.ds(pl.multiple_of(m * tm, tm), tm)
    f32 = jnp.float32

    # One-time seed of the carried feature scratch from the (XLA-computed) stem output.
    @pl.when((r == 0) & (s == 0) & (m == 0))
    def _():
        cp = pltpu.make_async_copy(h_hbm_ref, h_scr, dma_sem)
        cp.start()
        cp.wait()

    def cheb(feat_scr, wa_ref, wb_ref, bias_ref):
        # DGL ChebConv k=2 with D^-1/2 / A^T / 2/lambda_max / (renorm-1)*I folded in B:
        #   X1 = B @ X0 ; out = relu([X0, X1] @ W + b)      (default activation = relu)
        # Dominant matmul: bf16 B row-tile x bf16 feature scratch -> f32 on the MXU.
        x1 = jnp.dot(b_ref[...], feat_scr[...], preferred_element_type=f32)
        x0 = feat_scr[row, :].astype(f32)
        y = (jnp.dot(x0, wa_ref[...], preferred_element_type=f32)
             + jnp.dot(x1, wb_ref[...], preferred_element_type=f32)
             + bias_ref[...])
        return jnp.maximum(y, 0.0), x0

    # ---- stage 0: h0[rows m] = conv1(h)[rows m] ----
    @pl.when(s == 0)
    def _():
        h0, _ = cheb(h_scr, wc1a_ref, wc1b_ref, bc1_ref)
        h0_scr[row, :] = h0.astype(h0_scr.dtype)

        # Keep the row-tiled output block defined on every grid step; earlier
        # writebacks are overwritten by the final relation's pass (last-writer-wins).
        @pl.when(r == 0)
        def _():
            out_ref[...] = jnp.zeros_like(out_ref)

        @pl.when(r > 0)
        def _():
            out_ref[...] = acc_scr[row, :]

    # ---- stage 1: h1 = conv2(h0); h = linear3([h0, h1]); accumulate over relations ----
    @pl.when(s == 1)
    def _():
        h1, h0f = cheb(h0_scr, wc2a_ref, wc2b_ref, bc2_ref)
        h_new = (jnp.dot(h0f, wl3a_ref[...], preferred_element_type=f32)
                 + jnp.dot(h1, wl3b_ref[...], preferred_element_type=f32)
                 + bl3_ref[...])
        h_scr[row, :] = h_new.astype(h_scr.dtype)      # carried into the next relation

        @pl.when(r == 0)
        def _():
            acc_scr[row, :] = h_new

        @pl.when(r > 0)
        def _():
            acc_scr[row, :] = acc_scr[row, :] + h_new

        out_ref[...] = acc_scr[row, :]


def chebconv_gad_hetero(x, b_mats, params, *, tm=256,
                        compute_dtype=jnp.bfloat16,
                        vmem_limit_bytes=48 * 1024 * 1024):
    """x: (N, Fin) f32 node features.  b_mats: (R, N, N) folded propagation matrices.
    params: torch-layout ([in, out]) weights.  Returns (N, C) f32 logits.
    compute_dtype: dtype of B and the carried feature scratches (bf16 = fast path,
    f32 = exact-semantics validation path)."""
    N, Fin = x.shape
    R = b_mats.shape[0]
    H = params["wl"].shape[1]
    C = params["wl4"].shape[1]
    f32 = jnp.float32

    assert tm % 16 == 0, "row tile must keep bf16 sublane packing aligned"
    Hp = _round_up(H, 128)              # lane-dense hidden width
    Np = _round_up(N, tm)               # row-tileable node count
    M = Np // tm

    def padw(w, rows, cols):
        out = jnp.zeros((rows, cols), f32)
        return out.at[:w.shape[0], :w.shape[1]].set(w.astype(f32))

    def split_pad(w):                   # (2H, H) concat-weight -> X0 half, X1 half
        return padw(w[:H], Hp, Hp), padw(w[H:], Hp, Hp)

    wc1a, wc1b = split_pad(params["wc1"]); bc1 = padw(params["bc1"], 1, Hp)
    wc2a, wc2b = split_pad(params["wc2"]); bc2 = padw(params["bc2"], 1, Hp)
    wl3a, wl3b = split_pad(params["wl3"]); bl3 = padw(params["bl3"], 1, Hp)

    # ---- stem hoisted to XLA (~0.1% of FLOPs): h = leaky(leaky(x Wl + bl) Wl2 + bl2)
    h = _leaky(x.astype(f32) @ params["wl"].astype(f32)
               + params["bl"].astype(f32).reshape(1, -1))
    h = _leaky(h @ params["wl2"].astype(f32)
               + params["bl2"].astype(f32).reshape(1, -1))
    hp = jnp.zeros((Np, Hp), f32).at[:N, :H].set(h).astype(compute_dtype)

    # Folded propagation matrices, zero-padded then narrowed.  Padded rows/cols are
    # exactly zero, so relu(bias) garbage in padded feature rows cannot leak back in.
    bp = jnp.zeros((R, Np, Np), f32).at[:, :N, :N].set(b_mats.astype(f32))
    bp = bp.astype(compute_dtype)

    def fixed(shape):
        return pl.BlockSpec(shape, lambda r, s, m, n=len(shape): (0,) * n)

    in_specs = [
        pl.BlockSpec(memory_space=pl.ANY),                        # h stem (copied once)
        pl.BlockSpec((None, tm, Np), lambda r, s, m: (r, m, 0)),  # B row tile
        fixed((Hp, Hp)), fixed((Hp, Hp)), fixed((1, Hp)),         # conv1 (split W)
        fixed((Hp, Hp)), fixed((Hp, Hp)), fixed((1, Hp)),         # conv2 (split W)
        fixed((Hp, Hp)), fixed((Hp, Hp)), fixed((1, Hp)),         # linear3 (split W)
    ]

    acc = pl.pallas_call(
        chebgad_kernel,
        out_shape=jax.ShapeDtypeStruct((Np, Hp), f32),
        grid_spec=pltpu.PrefetchScalarGridSpec(
            num_scalar_prefetch=0,
            grid=(R, 2, M),
            in_specs=in_specs,
            out_specs=pl.BlockSpec((tm, Hp), lambda r, s, m: (m, 0)),
            scratch_shapes=[
                pltpu.VMEM((Np, Hp), compute_dtype),   # h   (carried across relations)
                pltpu.VMEM((Np, Hp), compute_dtype),   # h0  (stage 0 -> stage 1)
                pltpu.VMEM((Np, Hp), f32),             # relation accumulator
                pltpu.SemaphoreType.DMA(()),           # one-time h seed copy
            ]),
        compiler_params=pltpu.CompilerParams(
            dimension_semantics=("arbitrary", "arbitrary", "arbitrary"),
            vmem_limit_bytes=vmem_limit_bytes),
    )(hp, bp, wc1a, wc1b, bc1, wc2a, wc2b, bc2, wl3a, wl3b, bl3)

    # ---- tail hoisted to XLA: logits = leaky(sum_r h_r) @ W4 + b4
    h_all = _leaky(acc[:N, :H])
    return h_all @ params["wl4"].astype(f32) + params["bl4"].astype(f32).reshape(1, -1)


# ----------------------- pure-JAX references (PyTorch semantics) -----------------------
def reference(x, a_t, dinv, renorm, full):
    """Transliteration of the PyTorch module (dataset='amazon' branch)."""
    h = _leaky(x @ full["wl"] + full["bl"])
    h = _leaky(h @ full["wl2"] + full["bl2"])
    h_all = []
    for r in range(a_t.shape[0]):
        at, dv, rn = a_t[r], dinv[r], renorm[r]

        def cheb(feat, w, b):
            agg = (at @ (feat * dv)) * dv
            x1 = -rn * agg + feat * (rn - 1.0)
            xt = jnp.concatenate([feat, x1], axis=-1)
            return jnp.maximum(xt @ w + b, 0.0)

        h0 = cheb(h, full["wc1"], full["bc1"])
        h1 = cheb(h0, full["wc2"], full["bc2"])
        h = jnp.concatenate([h0, h1], axis=-1) @ full["wl3"] + full["bl3"]
        h_all.append(h)
    h_all = jnp.stack(h_all).sum(0)
    h_all = _leaky(h_all)
    return h_all @ full["wl4"] + full["bl4"]


def reference_quantized(x, b_mats, full, dtype):
    """Same math as the kernel's fast path: B and the carried feature scratches rounded
    to `dtype`, matmuls accumulated in f32 (as on the MXU)."""
    def q(v):
        return v.astype(dtype).astype(jnp.float32)

    h = _leaky(x @ full["wl"] + full["bl"])
    h = _leaky(h @ full["wl2"] + full["bl2"])
    hq = q(h)
    bq = q(b_mats)
    acc = None
    for r in range(b_mats.shape[0]):
        B = bq[r]

        def cheb(fq, w, b):
            xt = jnp.concatenate([fq, B @ fq], axis=-1)
            return jnp.maximum(xt @ w + b, 0.0)

        h0q = q(cheb(hq, full["wc1"], full["bc1"]))
        h1 = cheb(h0q, full["wc2"], full["bc2"])
        h_new = jnp.concatenate([h0q, h1], axis=-1) @ full["wl3"] + full["bl3"]
        acc = h_new if acc is None else acc + h_new
        hq = q(h_new)
    return _leaky(acc) @ full["wl4"] + full["bl4"]


if __name__ == "__main__":
    # TODO(synk): only the dataset=='amazon' branch is implemented; the non-amazon
    # degree-mask subgraph split (data-dependent DGL subgraph construction) is
    # host-side glue with no clean in-kernel equivalent.
    N, Fin, H, C, R = 200, 16, 32, 2, 3

    key = jax.random.PRNGKey(0)
    ks = jax.random.split(key, 16)

    x = jax.random.normal(ks[0], (N, Fin), dtype=jnp.float32)

    # synthetic undirected multi-relation graph (dense adjacency, no self loops)
    a_rand = jax.random.bernoulli(ks[1], p=0.15, shape=(R, N, N))
    a = jnp.maximum(a_rand, jnp.transpose(a_rand, (0, 2, 1))).astype(jnp.float32)
    eye = jnp.eye(N, dtype=jnp.float32)[None]
    a = a * (1.0 - eye)
    a_np = np.asarray(a)

    # in-degrees, D^-1/2 (clamped like DGL), lambda_max via dense eigensolve
    deg = a_np.sum(axis=1)                       # in_deg[v] = sum_u A[u, v]
    dinv_np = 1.0 / np.sqrt(np.clip(deg, 1.0, None))
    lam = []
    for rr in range(R):
        L = np.eye(N) - dinv_np[rr][:, None] * a_np[rr] * dinv_np[rr][None, :]
        ev = np.linalg.eigvals(L)
        lam.append(np.max(np.abs(ev.real)))
    lam = np.asarray(lam, dtype=np.float32)

    a_t = jnp.transpose(a, (0, 2, 1))                                    # [R,N,N]
    dinv = jnp.asarray(dinv_np, dtype=jnp.float32).reshape(R, N, 1)      # [R,N,1]
    renorm = jnp.asarray(2.0 / lam, dtype=jnp.float32).reshape(R, 1, 1)  # [R,1,1]

    # host-side fold: B_r = -renorm_r * D^-1/2 A^T D^-1/2 + (renorm_r - 1) * I
    b_mats = (-renorm * (dinv * a_t * jnp.transpose(dinv, (0, 2, 1)))
              + (renorm - 1.0) * jnp.eye(N, dtype=jnp.float32)[None])

    # deterministic synthetic parameters (PyTorch Linear -> stored as [in, out])
    def lin(k, fan_in, fan_out):
        s = 1.0 / np.sqrt(fan_in)
        kw, kb = jax.random.split(k)
        w = jax.random.uniform(kw, (fan_in, fan_out), jnp.float32, -s, s)
        b = jax.random.uniform(kb, (1, fan_out), jnp.float32, -s, s)
        return w, b

    wl, bl = lin(ks[2], Fin, H)        # self.linear
    wl2, bl2 = lin(ks[3], H, H)        # self.linear2
    wc1, bc1 = lin(ks[4], 2 * H, H)    # ChebConv conv1 (Linear(k*H, H))
    wc2, bc2 = lin(ks[5], 2 * H, H)    # ChebConv conv2
    wl3, bl3 = lin(ks[6], 2 * H, H)    # self.linear3
    wl4, bl4 = lin(ks[7], H, C)        # self.linear4

    full = dict(wl=wl, bl=bl, wl2=wl2, bl2=bl2, wc1=wc1, bc1=bc1,
                wc2=wc2, bc2=bc2, wl3=wl3, bl3=bl3, wl4=wl4, bl4=bl4)

    ref = reference(x, a_t, dinv, renorm, full)

    # 1) exact-semantics path: f32 everywhere; tm=128 exercises the multi-row-tile grid
    out_f32 = jax.block_until_ready(
        chebconv_gad_hetero(x, b_mats, full, tm=128, compute_dtype=jnp.float32))
    np.testing.assert_allclose(np.asarray(out_f32), np.asarray(ref),
                               rtol=2e-4, atol=2e-4)

    # 2) fast path with a multi-tile grid: bf16 B / bf16 feature scratch, f32 accumulate
    ref_q = reference_quantized(x, b_mats, full, jnp.bfloat16)
    out_bf16_t128 = jax.block_until_ready(
        chebconv_gad_hetero(x, b_mats, full, tm=128, compute_dtype=jnp.bfloat16))
    np.testing.assert_allclose(np.asarray(out_bf16_t128), np.asarray(ref_q),
                               rtol=2e-3, atol=2e-3)

    # 3) fast path with default tiling (tm=256); also sanity-check vs true f32 semantics
    out_bf16 = jax.block_until_ready(chebconv_gad_hetero(x, b_mats, full))
    np.testing.assert_allclose(np.asarray(out_bf16), np.asarray(ref_q),
                               rtol=2e-3, atol=2e-3)
    np.testing.assert_allclose(np.asarray(out_bf16), np.asarray(ref),
                               rtol=1e-1, atol=1e-1)

    print("KERNEL_OK")
</pallas_src>

<mosaic_0001>
module attributes {stable_mosaic.version = 11 : i64} {
  func.func @chebgad_kernel(%arg0: i32, %arg1: i32, %arg2: i32, %arg3: memref<256x128xf32, #tpu.memory_space<any>>, %arg4: memref<1x128x256xf32, #tpu.memory_space<vmem>>, %arg5: memref<128x128xf32, #tpu.memory_space<vmem>>, %arg6: memref<128x128xf32, #tpu.memory_space<vmem>>, %arg7: memref<1x128xf32, #tpu.memory_space<vmem>>, %arg8: memref<128x128xf32, #tpu.memory_space<vmem>>, %arg9: memref<128x128xf32, #tpu.memory_space<vmem>>, %arg10: memref<1x128xf32, #tpu.memory_space<vmem>>, %arg11: memref<128x128xf32, #tpu.memory_space<vmem>>, %arg12: memref<128x128xf32, #tpu.memory_space<vmem>>, %arg13: memref<1x128xf32, #tpu.memory_space<vmem>>, %arg14: memref<128x128xf32, #tpu.memory_space<vmem>>, %arg15: memref<256x128xf32, #tpu.memory_space<vmem>>, %arg16: memref<256x128xf32, #tpu.memory_space<vmem>>, %arg17: memref<256x128xf32, #tpu.memory_space<vmem>>, %arg18: memref<!tpu.dma_semaphore, #tpu.memory_space<semaphore_mem>>) attributes {dimension_semantics = [#tpu.dimension_semantics<arbitrary>, #tpu.dimension_semantics<arbitrary>, #tpu.dimension_semantics<arbitrary>], iteration_bounds = array<i64: 3, 2, 2>, scalar_prefetch = 0 : i64, scratch_operands = 4 : i64, tpu.core_type = #tpu.core_type<tc>, window_params = [{}, {transform_indices = @transform_1, window_bounds = array<i64: 1, 128, 256>}, {pipeline_mode = #tpu.pipeline_mode<synchronous>, transform_indices = @transform_2, window_bounds = array<i64: 128, 128>}, {pipeline_mode = #tpu.pipeline_mode<synchronous>, transform_indices = @transform_3, window_bounds = array<i64: 128, 128>}, {pipeline_mode = #tpu.pipeline_mode<synchronous>, transform_indices = @transform_4, window_bounds = array<i64: 1, 128>}, {pipeline_mode = #tpu.pipeline_mode<synchronous>, transform_indices = @transform_5, window_bounds = array<i64: 128, 128>}, {pipeline_mode = #tpu.pipeline_mode<synchronous>, transform_indices = @transform_6, window_bounds = array<i64: 128, 128>}, {pipeline_mode = #tpu.pipeline_mode<synchronous>, transform_indices = @transform_7, window_bounds = array<i64: 1, 128>}, {pipeline_mode = #tpu.pipeline_mode<synchronous>, transform_indices = @transform_8, window_bounds = array<i64: 128, 128>}, {pipeline_mode = #tpu.pipeline_mode<synchronous>, transform_indices = @transform_9, window_bounds = array<i64: 128, 128>}, {pipeline_mode = #tpu.pipeline_mode<synchronous>, transform_indices = @transform_10, window_bounds = array<i64: 1, 128>}, {transform_indices = @transform_11, window_bounds = array<i64: 128, 128>}]} {
    %c128_i32 = arith.constant 128 : i32
    %0 = arith.muli %arg2, %c128_i32 : i32
    %1 = tpu.assume_multiple %0, 128 : i32
    %c0_i32 = arith.constant 0 : i32
    %2 = arith.cmpi eq, %arg0, %c0_i32 : i32
    %c0_i32_0 = arith.constant 0 : i32
    %3 = arith.cmpi eq, %arg1, %c0_i32_0 : i32
    %4 = arith.andi %2, %3 : i1
    %c0_i32_1 = arith.constant 0 : i32
    %5 = arith.cmpi eq, %arg2, %c0_i32_1 : i32
    %6 = arith.andi %4, %5 : i1
    %7 = arith.extui %6 : i1 to i32
    %c0_i32_2 = arith.constant 0 : i32
    %8 = arith.cmpi ne, %7, %c0_i32_2 : i32
    scf.if %8 {
      tpu.enqueue_dma source(%arg3 : memref<256x128xf32, #tpu.memory_space<any>>) target(%arg15 : memref<256x128xf32, #tpu.memory_space<vmem>>) target_semaphore(%arg18 : memref<!tpu.dma_semaphore, #tpu.memory_space<semaphore_mem>>)
      tpu.wait_dma2 semaphore(%arg18 : memref<!tpu.dma_semaphore, #tpu.memory_space<semaphore_mem>>) src(%arg3 : memref<256x128xf32, #tpu.memory_space<any>>) dst(%arg15 : memref<256x128xf32, #tpu.memory_space<vmem>>)
    } else {
    }
    %c0_i32_3 = arith.constant 0 : i32
    %9 = arith.cmpi eq, %arg1, %c0_i32_3 : i32
    %10 = arith.extui %9 : i1 to i32
    %c0_i32_4 = arith.constant 0 : i32
    %11 = arith.cmpi ne, %10, %c0_i32_4 : i32
    scf.if %11 {
      %c0 = arith.constant 0 : index
      %c0_6 = arith.constant 0 : index
      %c0_7 = arith.constant 0 : index
      %15 = vector.load %arg4[%c0, %c0_6, %c0_7] : memref<1x128x256xf32, #tpu.memory_space<vmem>>, vector<1x128x256xf32>
      %16 = vector.shape_cast %15 : vector<1x128x256xf32> to vector<128x256xf32>
      %c0_8 = arith.constant 0 : index
      %c0_9 = arith.constant 0 : index
      %17 = vector.load %arg15[%c0_8, %c0_9] : memref<256x128xf32, #tpu.memory_space<vmem>>, vector<256x128xf32>
      %cst = arith.constant dense<0.000000e+00> : vector<128x128xf32>
      %18 = tpu.matmul %16, %17, %cst {dimension_numbers = #tpu.dot_dimension_numbers<[1], [0], [0], [1], [0, 0, 1, 1], [], []>} : vector<128x256xf32>, vector<256x128xf32>, vector<128x128xf32> -> vector<128x128xf32>
      %19 = arith.index_cast %1 : i32 to index
      %c0_10 = arith.constant 0 : index
      %20 = vector.load %arg15[%19, %c0_10] : memref<256x128xf32, #tpu.memory_space<vmem>>, vector<128x128xf32>
      %c0_11 = arith.constant 0 : index
      %c0_12 = arith.constant 0 : index
      %21 = vector.load %arg5[%c0_11, %c0_12] : memref<128x128xf32, #tpu.memory_space<vmem>>, vector<128x128xf32>
      %cst_13 = arith.constant dense<0.000000e+00> : vector<128x128xf32>
      %22 = tpu.matmul %20, %21, %cst_13 {dimension_numbers = #tpu.dot_dimension_numbers<[1], [0], [0], [1], [0, 0, 1, 1], [], []>} : vector<128x128xf32>, vector<128x128xf32>, vector<128x128xf32> -> vector<128x128xf32>
      %c0_14 = arith.constant 0 : index
      %c0_15 = arith.constant 0 : index
      %23 = vector.load %arg6[%c0_14, %c0_15] : memref<128x128xf32, #tpu.memory_space<vmem>>, vector<128x128xf32>
      %cst_16 = arith.constant dense<0.000000e+00> : vector<128x128xf32>
      %24 = tpu.matmul %18, %23, %cst_16 {dimension_numbers = #tpu.dot_dimension_numbers<[1], [0], [0], [1], [0, 0, 1, 1], [], []>} : vector<128x128xf32>, vector<128x128xf32>, vector<128x128xf32> -> vector<128x128xf32>
      %25 = arith.addf %22, %24 : vector<128x128xf32>
      %c0_17 = arith.constant 0 : index
      %c0_18 = arith.constant 0 : index
      %26 = vector.load %arg7[%c0_17, %c0_18] : memref<1x128xf32, #tpu.memory_space<vmem>>, vector<1x128xf32>
      %27 = vector.broadcast %26 : vector<1x128xf32> to vector<128x128xf32>
      %28 = arith.addf %25, %27 : vector<128x128xf32>
      %cst_19 = arith.constant 0.000000e+00 : f32
      %29 = vector.broadcast %cst_19 : f32 to vector<128x128xf32>
      %30 = arith.maximumf %28, %29 : vector<128x128xf32>
      %31 = arith.index_cast %1 : i32 to index
      %c0_20 = arith.constant 0 : index
      %32 = vector.load %arg16[%31, %c0_20] : memref<256x128xf32, #tpu.memory_space<vmem>>, vector<128x128xf32>
      tpu.vector_store %arg16[%31, %c0_20], %30 {strides = array<i32>} : memref<256x128xf32, #tpu.memory_space<vmem>>, vector<128x128xf32>,
      %c0_i32_21 = arith.constant 0 : i32
      %33 = arith.cmpi eq, %arg0, %c0_i32_21 : i32
      %34 = arith.extui %33 : i1 to i32
      %c0_i32_22 = arith.constant 0 : i32
      %35 = arith.cmpi ne, %34, %c0_i32_22 : i32
      scf.if %35 {
        %cst_25 = arith.constant 0.000000e+00 : f32
        %39 = vector.broadcast %cst_25 : f32 to vector<128x128xf32>
        %c0_26 = arith.constant 0 : index
        %c0_27 = arith.constant 0 : index
        %40 = vector.load %arg14[%c0_26, %c0_27] : memref<128x128xf32, #tpu.memory_space<vmem>>, vector<128x128xf32>
        tpu.vector_store %arg14[%c0_26, %c0_27], %39 {strides = array<i32>} : memref<128x128xf32, #tpu.memory_space<vmem>>, vector<128x128xf32>,
      } else {
      }
      %c0_i32_23 = arith.constant 0 : i32
      %36 = arith.cmpi sgt, %arg0, %c0_i32_23 : i32
      %37 = arith.extui %36 : i1 to i32
      %c0_i32_24 = arith.constant 0 : i32
      %38 = arith.cmpi ne, %37, %c0_i32_24 : i32
      scf.if %38 {
        %39 = arith.index_cast %1 : i32 to index
        %c0_25 = arith.constant 0 : index
        %40 = vector.load %arg17[%39, %c0_25] : memref<256x128xf32, #tpu.memory_space<vmem>>, vector<128x128xf32>
        %c0_26 = arith.constant 0 : index
        %c0_27 = arith.constant 0 : index
        %41 = vector.load %arg14[%c0_26, %c0_27] : memref<128x128xf32, #tpu.memory_space<vmem>>, vector<128x128xf32>
        tpu.vector_store %arg14[%c0_26, %c0_27], %40 {strides = array<i32>} : memref<128x128xf32, #tpu.memory_space<vmem>>, vector<128x128xf32>,
      } else {
      }
    } else {
    }
    %c1_i32 = arith.constant 1 : i32
    %12 = arith.cmpi eq, %arg1, %c1_i32 : i32
    %13 = arith.extui %12 : i1 to i32
    %c0_i32_5 = arith.constant 0 : i32
    %14 = arith.cmpi ne, %13, %c0_i32_5 : i32
    scf.if %14 {
      %c0 = arith.constant 0 : index
      %c0_6 = arith.constant 0 : index
      %c0_7 = arith.constant 0 : index
      %15 = vector.load %arg4[%c0, %c0_6, %c0_7] : memref<1x128x256xf32, #tpu.memory_space<vmem>>, vector<1x128x256xf32>
      %16 = vector.shape_cast %15 : vector<1x128x256xf32> to vector<128x256xf32>
      %c0_8 = arith.constant 0 : index
      %c0_9 = arith.constant 0 : index
      %17 = vector.load %arg16[%c0_8, %c0_9] : memref<256x128xf32, #tpu.memory_space<vmem>>, vector<256x128xf32>
      %cst = arith.constant dense<0.000000e+00> : vector<128x128xf32>
      %18 = tpu.matmul %16, %17, %cst {dimension_numbers = #tpu.dot_dimension_numbers<[1], [0], [0], [1], [0, 0, 1, 1], [], []>} : vector<128x256xf32>, vector<256x128xf32>, vector<128x128xf32> -> vector<128x128xf32>
      %19 = arith.index_cast %1 : i32 to index
      %c0_10 = arith.constant 0 : index
      %20 = vector.load %arg16[%19, %c0_10] : memref<256x128xf32, #tpu.memory_space<vmem>>, vector<128x128xf32>
      %c0_11 = arith.constant 0 : index
      %c0_12 = arith.constant 0 : index
      %21 = vector.load %arg8[%c0_11, %c0_12] : memref<128x128xf32, #tpu.memory_space<vmem>>, vector<128x128xf32>
      %cst_13 = arith.constant dense<0.000000e+00> : vector<128x128xf32>
      %22 = tpu.matmul %20, %21, %cst_13 {dimension_numbers = #tpu.dot_dimension_numbers<[1], [0], [0], [1], [0, 0, 1, 1], [], []>} : vector<128x128xf32>, vector<128x128xf32>, vector<128x128xf32> -> vector<128x128xf32>
      %c0_14 = arith.constant 0 : index
      %c0_15 = arith.constant 0 : index
      %23 = vector.load %arg9[%c0_14, %c0_15] : memref<128x128xf32, #tpu.memory_space<vmem>>, vector<128x128xf32>
      %cst_16 = arith.constant dense<0.000000e+00> : vector<128x128xf32>
      %24 = tpu.matmul %18, %23, %cst_16 {dimension_numbers = #tpu.dot_dimension_numbers<[1], [0], [0], [1], [0, 0, 1, 1], [], []>} : vector<128x128xf32>, vector<128x128xf32>, vector<128x128xf32> -> vector<128x128xf32>
      %25 = arith.addf %22, %24 : vector<128x128xf32>
      %c0_17 = arith.constant 0 : index
      %c0_18 = arith.constant 0 : index
      %26 = vector.load %arg10[%c0_17, %c0_18] : memref<1x128xf32, #tpu.memory_space<vmem>>, vector<1x128xf32>
      %27 = vector.broadcast %26 : vector<1x128xf32> to vector<128x128xf32>
      %28 = arith.addf %25, %27 : vector<128x128xf32>
      %cst_19 = arith.constant 0.000000e+00 : f32
      %29 = vector.broadcast %cst_19 : f32 to vector<128x128xf32>
      %30 = arith.maximumf %28, %29 : vector<128x128xf32>
      %c0_20 = arith.constant 0 : index
      %c0_21 = arith.constant 0 : index
      %31 = vector.load %arg11[%c0_20, %c0_21] : memref<128x128xf32, #tpu.memory_space<vmem>>, vector<128x128xf32>
      %cst_22 = arith.constant dense<0.000000e+00> : vector<128x128xf32>
      %32 = tpu.matmul %20, %31, %cst_22 {dimension_numbers = #tpu.dot_dimension_numbers<[1], [0], [0], [1], [0, 0, 1, 1], [], []>} : vector<128x128xf32>, vector<128x128xf32>, vector<128x128xf32> -> vector<128x128xf32>
      %c0_23 = arith.constant 0 : index
      %c0_24 = arith.constant 0 : index
      %33 = vector.load %arg12[%c0_23, %c0_24] : memref<128x128xf32, #tpu.memory_space<vmem>>, vector<128x128xf32>
      %cst_25 = arith.constant dense<0.000000e+00> : vector<128x128xf32>
      %34 = tpu.matmul %30, %33, %cst_25 {dimension_numbers = #tpu.dot_dimension_numbers<[1], [0], [0], [1], [0, 0, 1, 1], [], []>} : vector<128x128xf32>, vector<128x128xf32>, vector<128x128xf32> -> vector<128x128xf32>
      %35 = arith.addf %32, %34 : vector<128x128xf32>
      %c0_26 = arith.constant 0 : index
      %c0_27 = arith.constant 0 : index
      %36 = vector.load %arg13[%c0_26, %c0_27] : memref<1x128xf32, #tpu.memory_space<vmem>>, vector<1x128xf32>
      %37 = vector.broadcast %36 : vector<1x128xf32> to vector<128x128xf32>
      %38 = arith.addf %35, %37 : vector<128x128xf32>
      %39 = arith.index_cast %1 : i32 to index
      %c0_28 = arith.constant 0 : index
      %40 = vector.load %arg15[%39, %c0_28] : memref<256x128xf32, #tpu.memory_space<vmem>>, vector<128x128xf32>
      tpu.vector_store %arg15[%39, %c0_28], %38 {strides = array<i32>} : memref<256x128xf32, #tpu.memory_space<vmem>>, vector<128x128xf32>,
      %c0_i32_29 = arith.constant 0 : i32
      %41 = arith.cmpi eq, %arg0, %c0_i32_29 : i32
      %42 = arith.extui %41 : i1 to i32
      %c0_i32_30 = arith.constant 0 : i32
      %43 = arith.cmpi ne, %42, %c0_i32_30 : i32
      scf.if %43 {
        %50 = arith.index_cast %1 : i32 to index
        %c0_36 = arith.constant 0 : index
        %51 = vector.load %arg17[%50, %c0_36] : memref<256x128xf32, #tpu.memory_space<vmem>>, vector<128x128xf32>
        tpu.vector_store %arg17[%50, %c0_36], %38 {strides = array<i32>} : memref<256x128xf32, #tpu.memory_space<vmem>>, vector<128x128xf32>,
      } else {
      }
      %c0_i32_31 = arith.constant 0 : i32
      %44 = arith.cmpi sgt, %arg0, %c0_i32_31 : i32
      %45 = arith.extui %44 : i1 to i32
      %c0_i32_32 = arith.constant 0 : i32
      %46 = arith.cmpi ne, %45, %c0_i32_32 : i32
      scf.if %46 {
        %50 = arith.index_cast %1 : i32 to index
        %c0_36 = arith.constant 0 : index
        %51 = vector.load %arg17[%50, %c0_36] : memref<256x128xf32, #tpu.memory_space<vmem>>, vector<128x128xf32>
        %52 = arith.addf %51, %38 : vector<128x128xf32>
        %53 = arith.index_cast %1 : i32 to index
        %c0_37 = arith.constant 0 : index
        %54 = vector.load %arg17[%53, %c0_37] : memref<256x128xf32, #tpu.memory_space<vmem>>, vector<128x128xf32>
        tpu.vector_store %arg17[%53, %c0_37], %52 {strides = array<i32>} : memref<256x128xf32, #tpu.memory_space<vmem>>, vector<128x128xf32>,
      } else {
      }
      %47 = arith.index_cast %1 : i32 to index
      %c0_33 = arith.constant 0 : index
      %48 = vector.load %arg17[%47, %c0_33] : memref<256x128xf32, #tpu.memory_space<vmem>>, vector<128x128xf32>
      %c0_34 = arith.constant 0 : index
      %c0_35 = arith.constant 0 : index
      %49 = vector.load %arg14[%c0_34, %c0_35] : memref<128x128xf32, #tpu.memory_space<vmem>>, vector<128x128xf32>
      tpu.vector_store %arg14[%c0_34, %c0_35], %48 {strides = array<i32>} : memref<128x128xf32, #tpu.memory_space<vmem>>, vector<128x128xf32>,
    } else {
    }
    return
  }
  func.func @transform_1(%arg0: i32, %arg1: i32, %arg2: i32) -> (i32, i32, i32) {
    %c0_i32 = arith.constant 0 : i32
    %c0_i32_0 = arith.constant 0 : i32
    return %arg0, %arg2, %c0_i32 : i32, i32, i32
  }
  func.func @transform_2(%arg0: i32, %arg1: i32, %arg2: i32) -> (i32, i32) {
    %c0_i32 = arith.constant 0 : i32
    %c0_i32_0 = arith.constant 0 : i32
    %c0_i32_1 = arith.constant 0 : i32
    return %c0_i32, %c0_i32_0 : i32, i32
  }
  func.func @transform_3(%arg0: i32, %arg1: i32, %arg2: i32) -> (i32, i32) {
    %c0_i32 = arith.constant 0 : i32
    %c0_i32_0 = arith.constant 0 : i32
    %c0_i32_1 = arith.constant 0 : i32
    return %c0_i32, %c0_i32_0 : i32, i32
  }
  func.func @transform_4(%arg0: i32, %arg1: i32, %arg2: i32) -> (i32, i32) {
    %c0_i32 = arith.constant 0 : i32
    %c0_i32_0 = arith.constant 0 : i32
    %c0_i32_1 = arith.constant 0 : i32
    return %c0_i32, %c0_i32_0 : i32, i32
  }
  func.func @transform_5(%arg0: i32, %arg1: i32, %arg2: i32) -> (i32, i32) {
    %c0_i32 = arith.constant 0 : i32
    %c0_i32_0 = arith.constant 0 : i32
    %c0_i32_1 = arith.constant 0 : i32
    return %c0_i32, %c0_i32_0 : i32, i32
  }
  func.func @transform_6(%arg0: i32, %arg1: i32, %arg2: i32) -> (i32, i32) {
    %c0_i32 = arith.constant 0 : i32
    %c0_i32_0 = arith.constant 0 : i32
    %c0_i32_1 = arith.constant 0 : i32
    return %c0_i32, %c0_i32_0 : i32, i32
  }
  func.func @transform_7(%arg0: i32, %arg1: i32, %arg2: i32) -> (i32, i32) {
    %c0_i32 = arith.constant 0 : i32
    %c0_i32_0 = arith.constant 0 : i32
    %c0_i32_1 = arith.constant 0 : i32
    return %c0_i32, %c0_i32_0 : i32, i32
  }
  func.func @transform_8(%arg0: i32, %arg1: i32, %arg2: i32) -> (i32, i32) {
    %c0_i32 = arith.constant 0 : i32
    %c0_i32_0 = arith.constant 0 : i32
    %c0_i32_1 = arith.constant 0 : i32
    return %c0_i32, %c0_i32_0 : i32, i32
  }
  func.func @transform_9(%arg0: i32, %arg1: i32, %arg2: i32) -> (i32, i32) {
    %c0_i32 = arith.constant 0 : i32
    %c0_i32_0 = arith.constant 0 : i32
    %c0_i32_1 = arith.constant 0 : i32
    return %c0_i32, %c0_i32_0 : i32, i32
  }
  func.func @transform_10(%arg0: i32, %arg1: i32, %arg2: i32) -> (i32, i32) {
    %c0_i32 = arith.constant 0 : i32
    %c0_i32_0 = arith.constant 0 : i32
    %c0_i32_1 = arith.constant 0 : i32
    return %c0_i32, %c0_i32_0 : i32, i32
  }
  func.func @transform_11(%arg0: i32, %arg1: i32, %arg2: i32) -> (i32, i32) {
    %c0_i32 = arith.constant 0 : i32
    %c0_i32_0 = arith.constant 0 : i32
    return %arg2, %c0_i32 : i32, i32
  }
}

</mosaic_0001>

<bundles_post_ra>
// kernel: tpu_custom_call.1
= control target key start
LH: loop header
LB: loop body
LE: loop exit
PB: predicated region body
PF: predicated region fallthrough
CT: control target
= control target key end

     0   :  { %s3395_s0 = inlined_call_operand.hbm [shape: f32[256,128], index: 0, kind: input, shape index: {}]   ;;  %s3396_s1 = inlined_call_operand.hbm [shape: f32[3,256,256], index: 1, kind: input, shape index: {}]   ;;  %s3397_s2 = inlined_call_operand.hbm [shape: f32[128,128], index: 2, kind: input, shape index: {}]   ;;  %s3398_s3 = inlined_call_operand.hbm [shape: f32[128,128], index: 3, kind: input, shape index: {}]   ;;  %s3399_s4 = inlined_call_operand.vmem [shape: f32[1,128], index: 4, kind: input, shape index: {}]   ;;  %s3400_s5 = inlined_call_operand.hbm [shape: f32[128,128], index: 5, kind: input, shape index: {}]   ;;  %s3401_s6 = inlined_call_operand.hbm [shape: f32[128,128], index: 6, kind: input, shape index: {}]   ;;  %s3402_s7 = inlined_call_operand.vmem [shape: f32[1,128], index: 7, kind: input, shape index: {}]   ;;  %s3403_s8 = inlined_call_operand.hbm [shape: f32[128,128], index: 8, kind: input, shape index: {}]   ;;  %s3404_s9 = inlined_call_operand.hbm [shape: f32[128,128], index: 9, kind: input, shape index: {}]   ;;  %s3405_s10 = inlined_call_operand.vmem [shape: f32[1,128], index: 10, kind: input, shape index: {}]   ;;  %s3406_s11 = inlined_call_operand.hbm [shape: f32[256,128], index: 11, kind: output, shape index: {}]  }
   0x1   :  { %3416 = sst [smem:[#allocation38_spill]] %s3395_s0 }
   0x2   :  { %3417 = sst [smem:[#allocation39_spill]] %s3397_s2 }
   0x3   :  { %3418 = sst [smem:[#allocation40_spill]] %s3398_s3 }
   0x4   :  { %3419 = sst [smem:[#allocation41_spill]] %s3399_s4 }
   0x5   :  { %3420 = sst [smem:[#allocation42_spill]] %s3400_s5 }
   0x6   :  { %3421 = sst [smem:[#allocation43_spill]] %s3401_s6 }
   0x7   :  { %3422 = sst [smem:[#allocation44_spill]] %s3402_s7 }
   0x8   :  { %3423 = sst [smem:[#allocation45_spill]] %s3403_s8 }
   0x9   :  { %3424 = sst [smem:[#allocation46_spill]] %s3404_s9 }
   0xa   :  { %3425 = sst [smem:[#allocation47_spill]] %s3405_s10 }
   0xb   :  { %3426 = sst [smem:[#allocation48_spill]] %s3406_s11 }
   0xc   :  { %16 = vsyncpa [#allocation7], 0 }
   0xd   :  { %18 = vsyncpa [#allocation7 + $0x1], 0 }
   0xe   :  { %19 = vsyncpa [#allocation10], 0 }
   0xf   :  { %20 = vsyncpa [#allocation13], 0 }
  0x10   :  { %21 = vsyncpa [#allocation16], 0 }
  0x11   :  { %22 = vsyncpa [#allocation8], 0 }
  0x12   :  { %24 = vsyncpa [#allocation8 + $0x1], 0  ;;  %s2657_s17 = smov 0   ;;  %s2659_s18 = smov 0  }
  0x13   :  { %s2661_s19 = smov 0   ;;  %s2663_s20 = smov 0  }
  0x14   :  { %s2665_s21 = smov 0   ;;  %s2667_s22 = smov 0  }
  0x15   :  { %s2669_s23 = smov 0   ;;  %s2671_s24 = smov 0  }
  0x16   :  { %s2673_s25 = smov 0   ;;  %s2675_s26 = smov 0  }
  0x17   :  { %s2677_s27 = smov 0   ;;  %s2679_s28 = smov 0  }
  0x18   :  { %s2681_s29 = smov 0  }
  0x19 LB: > { %3427 = sst [smem:[#allocation29_spill]] %s2557_s23  ;;  %s3408_s30 = sadd.s32 4294967295, %s2581_s29   ;;  %s2581_s29 = sphi %s2681_s29, %s30_s29   ;;  %s2577_s28 = sphi %s2679_s28, %s3477_s28   ;;  %s2573_s27 = sphi %s2677_s27, %s3468_s27   ;;  %s2569_s26 = sphi %s2675_s26, %s3467_s26   ;;  %s2565_s25 = sphi %s2673_s25, %s3476_s25   ;;  %s2561_s24 = sphi %s2671_s24, %s3466_s24   ;;  %s2557_s23 = sphi %s2669_s23, %s3465_s23   ;;  %s2553_s22 = sphi %s2667_s22, %s3475_s22   ;;  %s2549_s21 = sphi %s2665_s21, %s3474_s21   ;;  %s2545_s20 = sphi %s2663_s20, %s3473_s20   ;;  %s2541_s19 = sphi %s2661_s19, %s3472_s19   ;;  %s2537_s18 = sphi %s2659_s18, %s3471_s18   ;;  %s2533_s17 = sphi %s2657_s17, %s3470_s17  }
  0x1a   : > { %3428 = sst [smem:[#allocation30_spill]] %s2561_s24  ;;  %p1925_p0 = scmp.ge.s32.totalorder %s2581_s29, 1 }
  0x1b   : > { %3429 = sst [smem:[#allocation31_spill]] %s2565_s25  ;;  %p2726_p1 = scmp.eq.s32.totalorder %s3408_s30, 0 }
  0x1c   : > { %3430 = sst [smem:[#allocation32_spill]] %s2569_s26  ;;  %p297_p2 = scmp.lt.s32.totalorder %s2581_s29, 13 }
  0x1d   : > { %3431 = sst [smem:[#allocation33_spill]] %s2573_s27  ;;  %s2583_s11 = smov [#allocation9]  }
  0x1e   : > { %s3433_s2 = sld [smem:[#allocation39_spill]]  ;;  %p2734_p3 = pnand %p1925_p0, %p297_p2 }
  0x1f   : > { %s310_s10 = sshll.u32 %s2583_s11, 4  ;;  %s3437_s5 = sld [smem:[#allocation42_spill]]  ;;  %s311_s10 = int_to_ptr.vmem [resolvable:$true] %s310_s10 }
  0x20   : > { %s3434_s16 = scalar_select %p2734_p3, 1, 0 }
  0x21   : > { %p2025_p4 = pneg %p2734_p3  ;;  %s2584_s14 = smov 128  }
  0x22   : > { %3435 = sst [smem:[#allocation34_spill]] %s3434_s16  ;;  %s2586_s11 = smov [#allocation12]  }
  0x23   : > { %p2742_p5 = pnand %p2025_p4, %p2726_p1  ;;  %s341_s0 = sshll.u32 %s2586_s11, 4  ;;  %s342_s0 = int_to_ptr.vmem [resolvable:$true] %s341_s0 }
  0x24   : > { %s308_s15 = sshll.u32 %s3433_s2, 4  ;;  %s2585_s2 = smov 8   ;;  %s309_s15 = int_to_ptr.hbm [resolvable:$true] %s308_s15 }
  0x25   : > { %s339_s13 = sshll.u32 %s3437_s5, 4  ;;  %s3438_s8 = sld [smem:[#allocation45_spill]]  ;;  %s340_s13 = int_to_ptr.hbm [resolvable:$true] %s339_s13 }
  0x26   : > { %2028 = dma.hbm_to_vmem [thread:$0]  (!%p2742_p5), %s309_s15, 2048, %s311_s10, [#allocation10], %s2584_s14, %s2584_s14, %s2585_s2  }
  0x27   : > { %2034 = dma.hbm_to_vmem [thread:$0]  (!%p2742_p5), %s340_s13, 2048, %s342_s0, [#allocation13], %s2584_s14, %s2584_s14, %s2585_s2  }
  0x28   : > { %s3439_s3 = sld [smem:[#allocation40_spill]]  ;;  %s2587_s16 = smov [#allocation15]  }
  0x29   : > { %s372_s10 = sshll.u32 %s2587_s16, 4  ;;  %s2588_s24 = smov [#allocation11]   ;;  %s373_s10 = int_to_ptr.vmem [resolvable:$true] %s372_s10 }
  0x2a   : > { %s324_s25 = sshll.u32 %s2588_s24, 4  ;;  %s3440_s6 = sld [smem:[#allocation43_spill]]  ;;  %s325_s25 = int_to_ptr.vmem [resolvable:$true] %s324_s25 }
  0x2b   : > { %s370_s23 = sshll.u32 %s3438_s8, 4  ;;  %s3441_s9 = sld [smem:[#allocation46_spill]]  ;;  %s371_s23 = int_to_ptr.hbm [resolvable:$true] %s370_s23 }
  0x2c   : > { %2040 = dma.hbm_to_vmem [thread:$0]  (!%p2742_p5), %s371_s23, 2048, %s373_s10, [#allocation16], %s2584_s14, %s2584_s14, %s2585_s2  }
  0x2d   : > { %s2589_s4 = smov [#allocation14]   ;;  %s1924_s24 = sadd.s32 4294967294, %s2581_s29  }
  0x2e   : > { %s322_s5 = sshll.u32 %s3439_s3, 4  ;;  %s355_s7 = sshll.u32 %s2589_s4, 4  ;;  %s323_s5 = int_to_ptr.hbm [resolvable:$true] %s322_s5  ;;  %s356_s7 = int_to_ptr.vmem [resolvable:$true] %s355_s7 }
  0x2f   : > { %2031 = dma.hbm_to_vmem [thread:$0]  (!%p2742_p5), %s323_s5, 2048, %s325_s25, [#allocation10], %s2584_s14, %s2584_s14, %s2585_s2  }
  0x30   : > { %s353_s13 = sshll.u32 %s3440_s6, 4  ;;  %s2590_s5 = smov [#allocation17]   ;;  %s354_s13 = int_to_ptr.hbm [resolvable:$true] %s353_s13 }
  0x31   : > { %s384_s11 = sshll.u32 %s3441_s9, 4  ;;  %s386_s10 = sshll.u32 %s2590_s5, 4  ;;  %s385_s11 = int_to_ptr.hbm [resolvable:$true] %s384_s11  ;;  %s387_s10 = int_to_ptr.vmem [resolvable:$true] %s386_s10 }
  0x32   : > { %2037 = dma.hbm_to_vmem [thread:$0]  (!%p2742_p5), %s354_s13, 2048, %s356_s7, [#allocation13], %s2584_s14, %s2584_s14, %s2585_s2  }
  0x33   : > { %2043 = dma.hbm_to_vmem [thread:$0]  (!%p2742_p5), %s385_s11, 2048, %s387_s10, [#allocation16], %s2584_s14, %s2584_s14, %s2585_s2  }
  0x34   : > { %s42_s25 = sadd.s32 1, %s2569_s26  ;;  %s45_s15 = sadd.s32 1, %s2573_s27 }
  0x35   : > { %p43_p6 = scmp.ge.s32.totalorder %s42_s25, 2  ;;  %s49_s0 = sadd.s32 1, %s2577_s28 }
  0x36   : > { %s58_s13 = sadd.s32 1, %s2553_s22  ;;  %p65_p7 = scmp.ne.s32.totalorder %s2553_s22, %s2549_s21 }
  0x37   : > { %s3479_s25 = smov (%p43_p6, %s42_s25), 0  ;;  %s3481_s15 = smov (!%p43_p6, %s45_s15), %s2573_s27 }
  0x38   : > { %3442 = sst [smem:[#allocation35_spill]] %s3479_s25  ;;  %s54_s30 = ssub.s32 %s2569_s26, %s3479_s25 }
  0x39   : > { %p47_p8 = scmp.ge.s32.totalorder %s3481_s15, 2  ;;  %p66_p9 = scmp.eq.s32.totalorder %s2581_s29, 0 }
  0x3a   : > { %p71_p10 = scmp.ne.s32.totalorder %s2549_s21, %s2545_s20  ;;  %p271_p11 = scmp.eq.s32.totalorder %s54_s30, 0 }
  0x3b   : > { %s3483_s15 = smov (%p47_p8, %s3481_s15), 0  ;;  %s3485_s0 = smov (!%p47_p8, %s49_s0), %s2577_s28 }
  0x3c   : > { %3443 = sst [smem:[#allocation36_spill]] %s3483_s15  ;;  %p2809_p12 = por %p66_p9, %p65_p7 }
  0x3d   : > { %p2815_p13 = por %p2726_p1, %p71_p10  ;;  %p51_p0 = scmp.ge.s32.totalorder %s3485_s0, 3 }
  0x3e   : > { %s273_s16 = sadd.s32 1, %s2541_s19  ;;  %p283_p2 = scmp.ne.s32.totalorder %s2541_s19, %s2537_s18 }
  0x3f   : > { %s2821_s20 = scalar_select %p271_p11, %s2541_s19, %s273_s16  }
  0x40   : > { %s3487_s0 = smov (%p51_p0, %s3485_s0), 0  ;;  %s3447_s23 = sadd.s32 4294967295, %s2581_s29  }
  0x41   : > { %3446 = sst [smem:[#allocation37_spill]] %s3487_s0  ;;  %p284_p4 = scmp.eq.s32.totalorder %s3447_s23, 11 }
  0x42   : > { %s53_s11 = ssub.s32 %s2577_s28, %s3487_s0  ;;  %p289_p5 = scmp.ne.s32.totalorder %s2537_s18, %s2533_s17 }
  0x43   : > { %s55_s4 = sor.u32 %s54_s30, %s53_s11  ;;  %p2833_p6 = por %p284_p4, %p283_p2 }
  0x44   : > { %p56_p7 = scmp.eq.s32.totalorder %s55_s4, 0  ;;  %p290_p8 = scmp.eq.s32.totalorder %s1924_s24, 11 }
  0x45   : > { %p2058_p9 = scmp.lt.s32.totalorder %s2581_s29, 12  ;;  %s403_s5 = sand.u32 1, %s2553_s22  }
  0x46   : > { %s2840_s10 = scalar_select %p56_p7, %s2553_s22, %s58_s13  }
  0x47   : > { %p2842_p10 = por %p290_p8, %p289_p5  ;;  %s1933_s23 = sshll.u32 %s403_s5, 8 }
  0x48   : > { %s1960_s3 = sshll.u32 %s2569_s26, 5  ;;  %s1936_s6 = sshll.u32 %s2577_s28, 6 }
  0x49   : > { %s413_s30 = sadd.s32 %s1960_s3, %s1936_s6  ;;  %s407_s11 = scalar_lea.vmem [#allocation6], %s1933_s23 }
  0x4a   : > { %s418_s8 = sshll.u32 %s407_s11, 4  ;;  %s1937_s9 = sshll.u32 %s413_s30, 3  ;;  %s419_s8 = int_to_ptr.vmem [resolvable:$true] %s418_s8 }
  0x4b   : > { %s415_s24 = scalar_lea.hbm %s3396_s1, %s1937_s9  ;;  %p2045_p11 = pnand %p2058_p9, %p2809_p12 }
  0x4c   : > { %s416_s13 = sshll.u32 %s415_s24, 4  ;;  %s404_s4 = scalar_lea.sflag [#allocation7], %s403_s5  ;;  %s417_s13 = int_to_ptr.hbm [resolvable:$true] %s416_s13 }
  0x4d   : > { %s2591_s25 = smov 256   ;;  %s2592_s27 = smov 16  }
  0x4e   : > { %2047 = dma.hbm_to_vmem [thread:$0]  (!%p2045_p11), %s417_s13, 4096, %s419_s8, %s404_s4, %s2591_s25, %s2591_s25, %s2592_s27  }
  0x4f   : > { %430 = sbr.rel (%p2734_p3) target bundleno = 1239 (0x4d7), region = 60  ;;  %s432_s3 = sand.u32 (!%p2734_p3), 1, %s2549_s21  }
  0x50   : > { %s1939_s6 = sshll.u32 (!%p2734_p3), %s432_s3, 8  ;;  %s433_s23 = scalar_lea.sflag (!%p2734_p3), [#allocation7], %s432_s3 }
  0x51   : > { %s2858_s30 = scalar_lea.vmem (!%p2734_p3), [#allocation6], %s1939_s6 }
  0x54   : > { %2508 = dma.done.wait (%p2815_p13), %s433_s23, 4096  }
  0x55   : > { %2510 = vsyncadd (%p2815_p13), %s433_s23, 4294963200 }
  0x56   : > { %2512 = dma.done.wait (%p2726_p1), [#allocation10], 4096  }
  0x57   : > { %2514 = vsyncadd (%p2726_p1), [#allocation10], 4294963200 }
  0x58   : > { %2516 = dma.done.wait (%p2726_p1), [#allocation13], 4096  }
  0x59   : > { %2518 = vsyncadd (%p2726_p1), [#allocation13], 4294963200 }
  0x5a   : > { %2520 = dma.done.wait (%p2726_p1), [#allocation16], 4096  }
  0x5b   : > { %2522 = vsyncadd (%p2726_p1), [#allocation16], 4294963200  ;;  %s3451_s8 = sld [smem:[#allocation29_spill]]  ;;  %s501_s27 = sand.u32 1, %s2537_s18  }
  0x5c   : > { %s3452_s9 = sld [smem:[#allocation31_spill]]  ;;  %s1946_s15 = sshll.u32 %s501_s27, 7 }
  0x5d   : > { %s3453_s26 = sld [smem:[#allocation30_spill]]  ;;  %s2593_s5 = smov [#allocation2]  }
  0x5e   : > { %s3454_s14 = sld [smem:[#allocation38_spill]]  ;;  %s525_s11 = sshll.u32 %s2593_s5, 4  ;;  %s526_s11 = int_to_ptr.vmem [resolvable:$true] %s525_s11 }
  0x5f   : > { %s2888_s24 = scalar_lea.vmem [#allocation18], %s1946_s15 }
  0x61   : > { %s2878_s25 = sshll.u32 %s3451_s8, 7  ;;  %p511_p13 = scmp.eq.s32.totalorder %s3451_s8, 0 }
  0x62   : > { %p507_p3 = scmp.eq.s32.totalorder %s3452_s9, 0 }
  0x63   : > { %p508_p12 = scmp.eq.s32.totalorder %s3453_s26, 0 }
  0x64   : > { %s523_s12 = sshll.u32 %s3454_s14, 4  ;;  %s524_s12 = int_to_ptr.hbm [resolvable:$true] %s523_s12 }
  0x65   : > { %p509_p0 = pnand %p508_p12, %p507_p3 }
  0x67   : > { %p510_p1 = pneg %p509_p0 }
  0x69   : > { %p512_p2 = pnand %p511_p13, %p510_p1 }
  0x6b   : > { %p2020_p4 = pneg %p512_p2 }
  0x6c   : > { %2021 = dma.hbm_to_vmem [thread:$0]  (!%p512_p2), %s524_s12, 4096, %s526_s11, [#allocation5] }
  0x6d   : > { %2524 = dma.done.wait (%p2020_p4), [#allocation5], 4096 }
  0x6e   : > { %2526 = vsyncadd (%p2020_p4), [#allocation5], 4294963200  ;;  %p1948_p5 = scmp.ne.s32.totalorder %s3453_s26, 0 }
  0x6f   : > { %s2918_s13 = scalar_lea.vmem (!%p1948_p5), [#allocation2], %s2878_s25  ;;  %s3455_s6 = sld [smem:[#allocation41_spill]] (!%p1948_p5) }
  0x70   : > { %534 = sbr.rel (%p1948_p5) target bundleno = 584 (0x248), region = 100  ;;  %s2949_s23 = scalar_lea.vmem (!%p1948_p5), [#allocation3], %s2878_s25 }
  0x71   : > { %s3456_s8 = sld [smem:[#allocation31_spill]] (!%p1948_p5) }
  0x75   : > { %v582_v0 = vld [vmem:[#allocation2 + $0x78] sm:$0xff]  ;;  %v581_v2 = vld [vmem:[#allocation2 + $0x70] sm:$0xff]  ;;  %v580_v4 = vld [vmem:[#allocation2 + $0x68] sm:$0xff] }
  0x76   : > { %v598_v1 = vld [vmem:[#allocation2 + $0xf8] sm:$0xff]  ;;  %599 = vmatpush.msra.mxu0 %v582_v0  ;;  %v597_v3 = vld [vmem:[#allocation2 + $0xf0] sm:$0xff]  ;;  %v596_v5 = vld [vmem:[#allocation2 + $0xe8] sm:$0xff] }
  0x77   : > { %664 = vmatpush.msra.mxu1 %v598_v1  ;;  %v579_v6 = vld [vmem:[#allocation2 + $0x60] sm:$0xff]  ;;  %v578_v8 = vld [vmem:[#allocation2 + $0x58] sm:$0xff]  ;;  %v577_v10 = vld [vmem:[#allocation2 + $0x50] sm:$0xff]  ;;  %p1949_p7 = scmp.ne.s32.totalorder %s3456_s8, 0 }
  0x78   : > { %600 = vmatpush.msra.mxu0 %v581_v2  ;;  %v595_v7 = vld [vmem:[#allocation2 + $0xe0] sm:$0xff]  ;;  %v594_v9 = vld [vmem:[#allocation2 + $0xd8] sm:$0xff]  ;;  %v593_v11 = vld [vmem:[#allocation2 + $0xd0] sm:$0xff] }
  0x79   : > { %665 = vmatpush.msra.mxu1 %v597_v3  ;;  %v576_v12 = vld [vmem:[#allocation2 + $0x48] sm:$0xff]  ;;  %v575_v14 = vld [vmem:[#allocation2 + $0x40] sm:$0xff]  ;;  %v574_v16 = vld [vmem:[#allocation2 + $0x38] sm:$0xff] }
  0x7a   : > { %601 = vmatpush.msra.mxu0 %v580_v4  ;;  %v592_v13 = vld [vmem:[#allocation2 + $0xc8] sm:$0xff]  ;;  %v591_v15 = vld [vmem:[#allocation2 + $0xc0] sm:$0xff]  ;;  %v590_v17 = vld [vmem:[#allocation2 + $0xb8] sm:$0xff] }
  0x7b   : > { %666 = vmatpush.msra.mxu1 %v596_v5  ;;  %v573_v18 = vld [vmem:[#allocation2 + $0x30] sm:$0xff]  ;;  %v572_v20 = vld [vmem:[#allocation2 + $0x28] sm:$0xff]  ;;  %v571_v22 = vld [vmem:[#allocation2 + $0x20] sm:$0xff] }
  0x7c   : > { %602 = vmatpush.msra.mxu0 %v579_v6  ;;  %v589_v19 = vld [vmem:[#allocation2 + $0xb0] sm:$0xff]  ;;  %v588_v21 = vld [vmem:[#allocation2 + $0xa8] sm:$0xff]  ;;  %v587_v23 = vld [vmem:[#allocation2 + $0xa0] sm:$0xff] }
  0x7d   : > { %667 = vmatpush.msra.mxu1 %v595_v7  ;;  %v570_v24 = vld [vmem:[#allocation2 + $0x18] sm:$0xff]  ;;  %v569_v26 = vld [vmem:[#allocation2 + $0x10] sm:$0xff]  ;;  %v568_v28 = vld [vmem:[#allocation2 + $0x8] sm:$0xff] }
  0x7e   : > { %603 = vmatpush.msra.mxu0 %v578_v8  ;;  %v586_v25 = vld [vmem:[#allocation2 + $0x98] sm:$0xff]  ;;  %v585_v27 = vld [vmem:[#allocation2 + $0x90] sm:$0xff]  ;;  %v584_v29 = vld [vmem:[#allocation2 + $0x88] sm:$0xff] }
  0x7f   : > { %668 = vmatpush.msra.mxu1 %v594_v9  ;;  %v567_v30 = vld [vmem:[#allocation2] sm:$0xff]  ;;  %v536_v33 = vld [vmem:[%s2858_s30 + $0x8] sm:$0xff]  ;;  %v537_v34 = vld [vmem:[%s2858_s30 + $0x10] sm:$0xff] }
  0x80   : > { %604 = vmatpush.msra.mxu0 %v577_v10  ;;  %v583_v31 = vld [vmem:[#allocation2 + $0x80] sm:$0xff]  ;;  %v538_v35 = vld [vmem:[%s2858_s30 + $0x18] sm:$0xff]  ;;  %v540_v37 = vld [vmem:[%s2858_s30 + $0x28] sm:$0xff] }
  0x81   : > { %669 = vmatpush.msra.mxu1 %v593_v11  ;;  %v535_v32 = vld [vmem:[%s2858_s30] sm:$0xff]  ;;  %v541_v38 = vld [vmem:[%s2858_s30 + $0x30] sm:$0xff]  ;;  %v542_v39 = vld [vmem:[%s2858_s30 + $0x38] sm:$0xff] }
  0x82   : > { %605 = vmatpush.msra.mxu0 %v576_v12  ;;  %v539_v36 = vld [vmem:[%s2858_s30 + $0x20] sm:$0xff]  ;;  %v544_v41 = vld [vmem:[%s2858_s30 + $0x48] sm:$0xff]  ;;  %v545_v42 = vld [vmem:[%s2858_s30 + $0x50] sm:$0xff] }
  0x83   : > { %670 = vmatpush.msra.mxu1 %v592_v13  ;;  %v543_v40 = vld [vmem:[%s2858_s30 + $0x40] sm:$0xff]  ;;  %v546_v43 = vld [vmem:[%s2858_s30 + $0x58] sm:$0xff]  ;;  %v548_v45 = vld [vmem:[%s2858_s30 + $0x68] sm:$0xff] }
  0x84   : > { %606 = vmatpush.msra.mxu0 %v575_v14  ;;  %v547_v44 = vld [vmem:[%s2858_s30 + $0x60] sm:$0xff]  ;;  %v549_v46 = vld [vmem:[%s2858_s30 + $0x70] sm:$0xff]  ;;  %v550_v47 = vld [vmem:[%s2858_s30 + $0x78] sm:$0xff] }
  0x85   : > { %671 = vmatpush.msra.mxu1 %v591_v15  ;;  %v551_v48 = vld [vmem:[%s2858_s30 + $0x80] sm:$0xff]  ;;  %v552_v49 = vld [vmem:[%s2858_s30 + $0x88] sm:$0xff]  ;;  %v777_v50 = vld [vmem:[#allocation11 + $0x78] sm:$0xff] }
  0x86   : > { %607 = vmatpush.msra.mxu0 %v574_v16  ;;  %v761_v51 = vld [vmem:[#allocation9 + $0x78] sm:$0xff]  ;;  %v776_v52 = vld [vmem:[#allocation11 + $0x70] sm:$0xff]  ;;  %778 = vmatpush.msra.mxu2 %v777_v50  ;;  %v775_v54 = vld [vmem:[#allocation11 + $0x68] sm:$0xff] }
  0x87   : > { %672 = vmatpush.msra.mxu1 %v590_v17  ;;  %843 = vmatpush.msra.mxu3 %v761_v51  ;;  %v760_v53 = vld [vmem:[#allocation9 + $0x70] sm:$0xff]  ;;  %v759_v55 = vld [vmem:[#allocation9 + $0x68] sm:$0xff]  ;;  %v774_v56 = vld [vmem:[#allocation11 + $0x60] sm:$0xff] }
  0x88   : > { %608 = vmatpush.msra.mxu0 %v573_v18  ;;  %779 = vmatpush.msra.mxu2 %v776_v52  ;;  %v758_v57 = vld [vmem:[#allocation9 + $0x60] sm:$0xff]  ;;  %v553_v58 = vld [vmem:[%s2858_s30 + $0x90] sm:$0xff]  ;;  %v554_v59 = vld [vmem:[%s2858_s30 + $0x98] sm:$0xff] }
  0x89   : > { %673 = vmatpush.msra.mxu1 %v589_v19  ;;  %844 = vmatpush.msra.mxu3 %v760_v53  ;;  %v773_v60 = vld [vmem:[#allocation11 + $0x58] sm:$0xff]  ;;  %v772_v62 = vld [vmem:[#allocation11 + $0x50] sm:$0xff]  ;;  %v771_v0 = vld [vmem:[#allocation11 + $0x48] sm:$0xff] }
  0x8a   : > { %609 = vmatpush.msra.mxu0 %v572_v20  ;;  %780 = vmatpush.msra.mxu2 %v775_v54  ;;  %v757_v61 = vld [vmem:[#allocation9 + $0x58] sm:$0xff]  ;;  %v756_v63 = vld [vmem:[#allocation9 + $0x50] sm:$0xff]  ;;  %v755_v1 = vld [vmem:[#allocation9 + $0x48] sm:$0xff] }
  0x8b   : > { %674 = vmatpush.msra.mxu1 %v588_v21  ;;  %845 = vmatpush.msra.mxu3 %v759_v55  ;;  %v770_v2 = vld [vmem:[#allocation11 + $0x40] sm:$0xff]  ;;  %v556_v5 = vld [vmem:[%s2858_s30 + $0xa8] sm:$0xff]  ;;  %v769_v6 = vld [vmem:[#allocation11 + $0x38] sm:$0xff] }
  0x8c   : > { %610 = vmatpush.msra.mxu0 %v571_v22  ;;  %781 = vmatpush.msra.mxu2 %v774_v56  ;;  %v754_v3 = vld [vmem:[#allocation9 + $0x40] sm:$0xff]  ;;  %v753_v7 = vld [vmem:[#allocation9 + $0x38] sm:$0xff]  ;;  %v768_v8 = vld [vmem:[#allocation11 + $0x30] sm:$0xff] }
  0x8d   : > { %675 = vmatpush.msra.mxu1 %v587_v23  ;;  %846 = vmatpush.msra.mxu3 %v758_v57  ;;  %v555_v4 = vld [vmem:[%s2858_s30 + $0xa0] sm:$0xff]  ;;  %v752_v9 = vld [vmem:[#allocation9 + $0x30] sm:$0xff]  ;;  %v767_v10 = vld [vmem:[#allocation11 + $0x28] sm:$0xff] }
  0x8e   : > { %611 = vmatpush.msra.mxu0 %v570_v24  ;;  %782 = vmatpush.msra.mxu2 %v773_v60  ;;  %v751_v11 = vld [vmem:[#allocation9 + $0x28] sm:$0xff]  ;;  %v766_v12 = vld [vmem:[#allocation11 + $0x20] sm:$0xff]  ;;  %v557_v14 = vld [vmem:[%s2858_s30 + $0xb0] sm:$0xff] }
  0x8f   : > { %676 = vmatpush.msra.mxu1 %v586_v25  ;;  %847 = vmatpush.msra.mxu3 %v757_v61  ;;  %v750_v13 = vld [vmem:[#allocation9 + $0x20] sm:$0xff]  ;;  %v558_v15 = vld [vmem:[%s2858_s30 + $0xb8] sm:$0xff]  ;;  %v764_v18 = vld [vmem:[#allocation11 + $0x10] sm:$0xff] }
  0x90   : > { %612 = vmatpush.msra.mxu0 %v569_v26  ;;  %783 = vmatpush.msra.mxu2 %v772_v62  ;;  %v765_v16 = vld [vmem:[#allocation11 + $0x18] sm:$0xff]  ;;  %v748_v19 = vld [vmem:[#allocation9 + $0x10] sm:$0xff]  ;;  %v763_v20 = vld [vmem:[#allocation11 + $0x8] sm:$0xff] }
  0x91   : > { %677 = vmatpush.msra.mxu1 %v585_v27  ;;  %848 = vmatpush.msra.mxu3 %v756_v63  ;;  %v749_v17 = vld [vmem:[#allocation9 + $0x18] sm:$0xff]  ;;  %v747_v21 = vld [vmem:[#allocation9 + $0x8] sm:$0xff]  ;;  %v559_v22 = vld [vmem:[%s2858_s30 + $0xc0] sm:$0xff] }
  0x92   : > { %613 = vmatpush.msra.mxu0 %v568_v28  ;;  %784 = vmatpush.msra.mxu2 %v771_v0  ;;  %v560_v23 = vld [vmem:[%s2858_s30 + $0xc8] sm:$0xff]  ;;  %v762_v24 = vld [vmem:[#allocation11] sm:$0xff]  ;;  %v561_v27 = vld [vmem:[%s2858_s30 + $0xd0] sm:$0xff] }
  0x93   : > { %678 = vmatpush.msra.mxu1 %v584_v29  ;;  %849 = vmatpush.msra.mxu3 %v755_v1  ;;  %v746_v25 = vld [vmem:[#allocation9] sm:$0xff]  ;;  %v562_v28 = vld [vmem:[%s2858_s30 + $0xd8] sm:$0xff]  ;;  %v731_v29 = vld [vmem:[%s2918_s13 + $0x8] sm:$0xff] }
  0x94   : > { %614 = vmatpush.msra.mxu0 %v567_v30  ;;  %785 = vmatpush.msra.mxu2 %v770_v2  ;;  %v730_v26 = vld [vmem:[%s2918_s13] sm:$0xff]  ;;  %v737_v51 = vld [vmem:[%s2918_s13 + $0x38] sm:$0xff]  ;;  %v740_v63 = vld [vmem:[%s2918_s13 + $0x50] sm:$0xff] }
  0x95   : > { %679 = vmatpush.msra.mxu1 %v583_v31  ;;  %615 = vmatmul.f32.vlgmr.msra.gmra.mxu0 %v535_v32  ;;  %v563_v30 = vld [vmem:[%s2858_s30 + $0xe0] sm:$0xff]  ;;  %v564_v31 = vld [vmem:[%s2858_s30 + $0xe8] sm:$0xff]  ;;  %v732_v32 = vld [vmem:[%s2918_s13 + $0x10] sm:$0xff] }
  0x96   : > { %680 = vmatmul.f32.vlgmr.msra.gmra.mxu1 %v536_v33  ;;  %850 = vmatpush.msra.mxu3 %v754_v3  ;;  %v565_v33 = vld [vmem:[%s2858_s30 + $0xf0] sm:$0xff]  ;;  %v738_v55 = vld [vmem:[%s2918_s13 + $0x40] sm:$0xff]  ;;  %v741_v3 = vld [vmem:[%s2918_s13 + $0x58] sm:$0xff] }
  0x97   : > { %786 = vmatpush.msra.mxu2 %v769_v6 }
  0x98   : > { %851 = vmatpush.msra.mxu3 %v753_v7  ;;  %v742_v7 = vld [vmem:[%s2918_s13 + $0x60] sm:$0xff] }
  0x99   : > { %787 = vmatpush.msra.mxu2 %v768_v8 }
  0x9a   : > { %852 = vmatpush.msra.mxu3 %v752_v9 }
  0x9b   : > { %788 = vmatpush.msra.mxu2 %v767_v10 }
  0x9c   : > { %853 = vmatpush.msra.mxu3 %v751_v11  ;;  %v743_v11 = vld [vmem:[%s2918_s13 + $0x68] sm:$0xff] }
  0x9d   : > { %618 = vmatmul.f32.gmra.mxu0 %v537_v34  ;;  %789 = vmatpush.msra.mxu2 %v766_v12  ;;  %v566_v34 = vld [vmem:[%s2858_s30 + $0xf8] sm:$0xff] }
  0x9e   : > { %683 = vmatmul.f32.gmra.mxu1 %v538_v35  ;;  %854 = vmatpush.msra.mxu3 %v750_v13  ;;  %v733_v35 = vld [vmem:[%s2918_s13 + $0x18] sm:$0xff] }
  0x9f   : > { %790 = vmatpush.msra.mxu2 %v765_v16 }
  0xa0   : > { %855 = vmatpush.msra.mxu3 %v749_v17 }
  0xa1   : > { %791 = vmatpush.msra.mxu2 %v764_v18 }
  0xa2   : > { %856 = vmatpush.msra.mxu3 %v748_v19  ;;  %v745_v19 = vld [vmem:[%s2918_s13 + $0x78] sm:$0xff] }
  0xa3   : > { %792 = vmatpush.msra.mxu2 %v763_v20 }
  0xa4   : > { %857 = vmatpush.msra.mxu3 %v747_v21 }
  0xa5   : > { %621 = vmatmul.f32.gmra.mxu0 %v539_v36  ;;  %793 = vmatpush.msra.mxu2 %v762_v24 }
  0xa6   : > { %686 = vmatmul.f32.gmra.mxu1 %v540_v37  ;;  %858 = vmatpush.msra.mxu3 %v746_v25 }
  0xa7   : > { %859 = vmatmul.f32.vlgmr.msra.gmra.mxu3 %v730_v26 }
  0xad   : > { %624 = vmatmul.f32.gmra.mxu0 %v541_v38 }
  0xae   : > { %689 = vmatmul.f32.gmra.mxu1 %v542_v39  ;;  %v734_v39 = vld [vmem:[%s2918_s13 + $0x20] sm:$0xff] }
  0xaf   : > { %862 = vmatmul.f32.gmra.mxu3 %v731_v29 }
  0xb5   : > { %627 = vmatmul.f32.gmra.mxu0 %v543_v40 }
  0xb6   : > { %692 = vmatmul.f32.gmra.mxu1 %v544_v41 }
  0xb7   : > { %865 = vmatmul.f32.gmra.mxu3 %v732_v32 }
  0xbd   : > { %630 = vmatmul.f32.gmra.mxu0 %v545_v42 }
  0xbe   : > { %695 = vmatmul.f32.gmra.mxu1 %v546_v43  ;;  %v735_v43 = vld [vmem:[%s2918_s13 + $0x28] sm:$0xff] }
  0xbf   : > { %868 = vmatmul.f32.gmra.mxu3 %v733_v35 }
  0xc5   : > { %633 = vmatmul.f32.gmra.mxu0 %v547_v44 }
  0xc6   : > { %698 = vmatmul.f32.gmra.mxu1 %v548_v45 }
  0xc7   : > { %871 = vmatmul.f32.gmra.mxu3 %v734_v39 }
  0xcd   : > { %636 = vmatmul.f32.gmra.mxu0 %v549_v46 }
  0xce   : > { %701 = vmatmul.f32.gmra.mxu1 %v550_v47  ;;  %v736_v47 = vld [vmem:[%s2918_s13 + $0x30] sm:$0xff] }
  0xcf   : > { %874 = vmatmul.f32.gmra.mxu3 %v735_v43 }
  0xd5   : > { %639 = vmatmul.f32.gmra.mxu0 %v551_v48 }
  0xd6   : > { %704 = vmatmul.f32.gmra.mxu1 %v552_v49 }
  0xd7   : > { %877 = vmatmul.f32.gmra.mxu3 %v736_v47 }
  0xdd   : > { %642 = vmatmul.f32.gmra.mxu0 %v553_v58 }
  0xde   : > { %707 = vmatmul.f32.gmra.mxu1 %v554_v59  ;;  %v739_v59 = vld [vmem:[%s2918_s13 + $0x48] sm:$0xff] }
  0xdf   : > { %880 = vmatmul.f32.gmra.mxu3 %v737_v51 }
  0xe5   : > { %645 = vmatmul.f32.gmra.mxu0 %v555_v4 }
  0xe6   : > { %710 = vmatmul.f32.gmra.mxu1 %v556_v5 }
  0xe7   : > { %883 = vmatmul.f32.gmra.mxu3 %v738_v55 }
  0xed   : > { %648 = vmatmul.f32.gmra.mxu0 %v557_v14 }
  0xee   : > { %713 = vmatmul.f32.gmra.mxu1 %v558_v15  ;;  %v744_v15 = vld [vmem:[%s2918_s13 + $0x70] sm:$0xff] }
  0xef   : > { %886 = vmatmul.f32.gmra.mxu3 %v739_v59 }
  0xf5   : > { %651 = vmatmul.f32.gmra.mxu0 %v559_v22 }
  0xf6   : > { %716 = vmatmul.f32.gmra.mxu1 %v560_v23 }
  0xf7   : > { %889 = vmatmul.f32.gmra.mxu3 %v740_v63 }
  0xfd   : > { %654 = vmatmul.f32.gmra.mxu0 %v561_v27 }
  0xfe   : > { %719 = vmatmul.f32.gmra.mxu1 %v562_v28 }
  0xff   : > { %892 = vmatmul.f32.gmra.mxu3 %v741_v3 }
 0x105   : > { %657 = vmatmul.f32.gmra.mxu0 %v563_v30 }
 0x106   : > { %722 = vmatmul.f32.gmra.mxu1 %v564_v31 }
 0x107   : > { %895 = vmatmul.f32.gmra.mxu3 %v742_v7 }
 0x10d   : > { %660 = vmatmul.f32.gmra.mxu0 %v565_v33 }
 0x10e   : > { %725 = vmatmul.f32.gmra.mxu1 %v566_v34 }
 0x10f   : > { %898 = vmatmul.f32.gmra.mxu3 %v743_v11 }
 0x112   : > { %v616_v36 = vpop.f32.mrf.mxu0 }
 0x113   : > { %v681_v37 = vpop.f32.mrf.mxu1 }
 0x114   : > { %v682_v38 = vadd.f32 %v681_v37, %v616_v36  ;;  %v2945_v36 = vld [vmem:[%s3455_s6] ss:$0 sm:$0xff] }
 0x116   : > { %794 = vmatmul.f32.vlgmr.msra.gmra.mxu2 %v682_v38 }
 0x117   : > { %901 = vmatmul.f32.gmra.mxu3 %v744_v15 }
 0x11a   : > { %v619_v40 = vpop.f32.mrf.mxu0 }
 0x11b   : > { %v684_v41 = vpop.f32.mrf.mxu1 }
 0x11c   : > { %v685_v42 = vadd.f32 %v684_v41, %v619_v40 }
 0x11e   : > { %797 = vmatmul.f32.gmra.mxu2 %v685_v42 }
 0x11f   : > { %904 = vmatmul.f32.gmra.mxu3 %v745_v19 }
 0x122   : > { %v622_v44 = vpop.f32.mrf.mxu0 }
 0x123   : > { %v687_v45 = vpop.f32.mrf.mxu1 }
 0x124   : > { %v688_v46 = vadd.f32 %v687_v45, %v622_v44 }
 0x126   : > { %800 = vmatmul.f32.gmra.mxu2 %v688_v46 }
 0x12a   : > { %v625_v48 = vpop.f32.mrf.mxu0  ;;  %v860_v23 = vpop.f32.mrf.mxu3 }
 0x12b   : > { %v690_v49 = vpop.f32.mrf.mxu1 }
 0x12c   : > { %v691_v50 = vadd.f32 %v690_v49, %v625_v48 }
 0x12e   : > { %803 = vmatmul.f32.gmra.mxu2 %v691_v50 }
 0x132   : > { %v628_v52 = vpop.f32.mrf.mxu0  ;;  %v863_v27 = vpop.f32.mrf.mxu3 }
 0x133   : > { %v693_v53 = vpop.f32.mrf.mxu1 }
 0x134   : > { %v694_v54 = vadd.f32 %v693_v53, %v628_v52 }
 0x136   : > { %806 = vmatmul.f32.gmra.mxu2 %v694_v54 }
 0x13a   : > { %v631_v56 = vpop.f32.mrf.mxu0  ;;  %v866_v34 = vpop.f32.mrf.mxu3 }
 0x13b   : > { %v696_v57 = vpop.f32.mrf.mxu1 }
 0x13c   : > { %v697_v58 = vadd.f32 %v696_v57, %v631_v56 }
 0x13e   : > { %809 = vmatmul.f32.gmra.mxu2 %v697_v58 }
 0x142   : > { %v634_v60 = vpop.f32.mrf.mxu0  ;;  %v869_v35 = vpop.f32.mrf.mxu3 }
 0x143   : > { %v699_v61 = vpop.f32.mrf.mxu1 }
 0x144   : > { %v700_v62 = vadd.f32 %v699_v61, %v634_v60 }
 0x146   : > { %812 = vmatmul.f32.gmra.mxu2 %v700_v62 }
 0x14a   : > { %v637_v0 = vpop.f32.mrf.mxu0  ;;  %v872_v42 = vpop.f32.mrf.mxu3 }
 0x14b   : > { %v702_v1 = vpop.f32.mrf.mxu1 }
 0x14c   : > { %v703_v2 = vadd.f32 %v702_v1, %v637_v0 }
 0x14e   : > { %815 = vmatmul.f32.gmra.mxu2 %v703_v2 }
 0x152   : > { %v640_v4 = vpop.f32.mrf.mxu0  ;;  %v875_v48 = vpop.f32.mrf.mxu3 }
 0x153   : > { %v705_v5 = vpop.f32.mrf.mxu1 }
 0x154   : > { %v706_v6 = vadd.f32 %v705_v5, %v640_v4 }
 0x156   : > { %818 = vmatmul.f32.gmra.mxu2 %v706_v6 }
 0x15a   : > { %v643_v8 = vpop.f32.mrf.mxu0  ;;  %v878_v54 = vpop.f32.mrf.mxu3 }
 0x15b   : > { %v708_v9 = vpop.f32.mrf.mxu1 }
 0x15c   : > { %v709_v10 = vadd.f32 %v708_v9, %v643_v8 }
 0x15e   : > { %821 = vmatmul.f32.gmra.mxu2 %v709_v10 }
 0x162   : > { %v646_v12 = vpop.f32.mrf.mxu0  ;;  %v881_v60 = vpop.f32.mrf.mxu3 }
 0x163   : > { %v711_v13 = vpop.f32.mrf.mxu1 }
 0x164   : > { %v712_v14 = vadd.f32 %v711_v13, %v646_v12 }
 0x166   : > { %824 = vmatmul.f32.gmra.mxu2 %v712_v14 }
 0x16a   : > { %v649_v16 = vpop.f32.mrf.mxu0  ;;  %v884_v2 = vpop.f32.mrf.mxu3 }
 0x16b   : > { %v714_v17 = vpop.f32.mrf.mxu1 }
 0x16c   : > { %v715_v18 = vadd.f32 %v714_v17, %v649_v16 }
 0x16e   : > { %827 = vmatmul.f32.gmra.mxu2 %v715_v18 }
 0x172   : > { %v652_v20 = vpop.f32.mrf.mxu0  ;;  %v887_v8 = vpop.f32.mrf.mxu3 }
 0x173   : > { %v717_v21 = vpop.f32.mrf.mxu1 }
 0x174   : > { %v718_v22 = vadd.f32 %v717_v21, %v652_v20 }
 0x176   : > { %830 = vmatmul.f32.gmra.mxu2 %v718_v22 }
 0x17a   : > { %v655_v24 = vpop.f32.mrf.mxu0  ;;  %v890_v14 = vpop.f32.mrf.mxu3 }
 0x17b   : > { %v720_v25 = vpop.f32.mrf.mxu1 }
 0x17c   : > { %v721_v26 = vadd.f32 %v720_v25, %v655_v24 }
 0x17e   : > { %833 = vmatmul.f32.gmra.mxu2 %v721_v26 }
 0x182   : > { %v658_v28 = vpop.f32.mrf.mxu0  ;;  %v893_v20 = vpop.f32.mrf.mxu3 }
 0x183   : > { %v723_v29 = vpop.f32.mrf.mxu1 }
 0x184   : > { %v724_v30 = vadd.f32 %v723_v29, %v658_v28 }
 0x186   : > { %836 = vmatmul.f32.gmra.mxu2 %v724_v30 }
 0x18a   : > { %v661_v31 = vpop.f32.mrf.mxu0  ;;  %v896_v26 = vpop.f32.mrf.mxu3 }
 0x18b   : > { %v726_v32 = vpop.f32.mrf.mxu1 }
 0x18c   : > { %v727_v33 = vadd.f32 %v726_v32, %v661_v31 }
 0x18e   : > { %839 = vmatmul.f32.gmra.mxu2 %v727_v33 }
 0x192   : > { %v899_v32 = vpop.f32.mrf.mxu3 }
 0x199   : > { %v795_v37 = vpop.f32.mrf.mxu2 }
 0x19a   : > { %v861_v38 = vadd.f32 %v860_v23, %v795_v37 }
 0x19c   : > { %v912_v39 = vadd.f32 %v2945_v36, %v861_v38 }
 0x19e   : > { %v928_v40 = vmax.f32 %v912_v39, 0.0  ;;  %v902_v39 = vpop.f32.mrf.mxu3 }
 0x1a0   : > { %945 = vst [vmem:[%s2949_s23] sm:$0xff] %v928_v40 }
 0x1a1   : > { %v798_v41 = vpop.f32.mrf.mxu2 }
 0x1a2   : > { %v864_v43 = vadd.f32 %v863_v27, %v798_v41 }
 0x1a4   : > { %v913_v44 = vadd.f32 %v2945_v36, %v864_v43 }
 0x1a6   : > { %v929_v45 = vmax.f32 %v913_v44, 0.0 }
 0x1a8   : > { %946 = vst [vmem:[%s2949_s23 + $0x8] sm:$0xff] %v929_v45  ;;  %v905_v45 = vpop.f32.mrf.mxu3 }
 0x1a9   : > { %v801_v46 = vpop.f32.mrf.mxu2 }
 0x1aa   : > { %v867_v47 = vadd.f32 %v866_v34, %v801_v46 }
 0x1ac   : > { %v914_v49 = vadd.f32 %v2945_v36, %v867_v47 }
 0x1ae   : > { %v930_v50 = vmax.f32 %v914_v49, 0.0 }
 0x1b0   : > { %947 = vst [vmem:[%s2949_s23 + $0x10] sm:$0xff] %v930_v50 }
 0x1b1   : > { %v804_v51 = vpop.f32.mrf.mxu2 }
 0x1b2   : > { %v870_v52 = vadd.f32 %v869_v35, %v804_v51 }
 0x1b4   : > { %v915_v53 = vadd.f32 %v2945_v36, %v870_v52 }
 0x1b6   : > { %v931_v55 = vmax.f32 %v915_v53, 0.0 }
 0x1b8   : > { %948 = vst [vmem:[%s2949_s23 + $0x18] sm:$0xff] %v931_v55 }
 0x1b9   : > { %v807_v56 = vpop.f32.mrf.mxu2 }
 0x1ba   : > { %v873_v57 = vadd.f32 %v872_v42, %v807_v56 }
 0x1bc   : > { %v916_v58 = vadd.f32 %v2945_v36, %v873_v57 }
 0x1be   : > { %v932_v59 = vmax.f32 %v916_v58, 0.0 }
 0x1c0   : > { %949 = vst [vmem:[%s2949_s23 + $0x20] sm:$0xff] %v932_v59 }
 0x1c1   : > { %v810_v61 = vpop.f32.mrf.mxu2 }
 0x1c2   : > { %v876_v62 = vadd.f32 %v875_v48, %v810_v61 }
 0x1c4   : > { %v917_v63 = vadd.f32 %v2945_v36, %v876_v62 }
 0x1c6   : > { %v933_v0 = vmax.f32 %v917_v63, 0.0 }
 0x1c8   : > { %950 = vst [vmem:[%s2949_s23 + $0x28] sm:$0xff] %v933_v0 }
 0x1c9   : > { %v813_v1 = vpop.f32.mrf.mxu2 }
 0x1ca   : > { %v879_v3 = vadd.f32 %v878_v54, %v813_v1 }
 0x1cc   : > { %v918_v4 = vadd.f32 %v2945_v36, %v879_v3 }
 0x1ce   : > { %v934_v5 = vmax.f32 %v918_v4, 0.0 }
 0x1d0   : > { %951 = vst [vmem:[%s2949_s23 + $0x30] sm:$0xff] %v934_v5 }
 0x1d1   : > { %v816_v6 = vpop.f32.mrf.mxu2 }
 0x1d2   : > { %v882_v7 = vadd.f32 %v881_v60, %v816_v6 }
 0x1d4   : > { %v919_v9 = vadd.f32 %v2945_v36, %v882_v7 }
 0x1d6   : > { %v935_v10 = vmax.f32 %v919_v9, 0.0 }
 0x1d8   : > { %952 = vst [vmem:[%s2949_s23 + $0x38] sm:$0xff] %v935_v10 }
 0x1d9   : > { %v819_v11 = vpop.f32.mrf.mxu2 }
 0x1da   : > { %v885_v12 = vadd.f32 %v884_v2, %v819_v11 }
 0x1dc   : > { %v920_v13 = vadd.f32 %v2945_v36, %v885_v12 }
 0x1de   : > { %v936_v15 = vmax.f32 %v920_v13, 0.0 }
 0x1e0   : > { %953 = vst [vmem:[%s2949_s23 + $0x40] sm:$0xff] %v936_v15 }
 0x1e1   : > { %v822_v16 = vpop.f32.mrf.mxu2 }
 0x1e2   : > { %v888_v17 = vadd.f32 %v887_v8, %v822_v16 }
 0x1e4   : > { %v921_v18 = vadd.f32 %v2945_v36, %v888_v17 }
 0x1e6   : > { %v937_v19 = vmax.f32 %v921_v18, 0.0 }
 0x1e8   : > { %954 = vst [vmem:[%s2949_s23 + $0x48] sm:$0xff] %v937_v19 }
 0x1e9   : > { %v825_v21 = vpop.f32.mrf.mxu2 }
 0x1ea   : > { %v891_v22 = vadd.f32 %v890_v14, %v825_v21 }
 0x1ec   : > { %v922_v23 = vadd.f32 %v2945_v36, %v891_v22 }
 0x1ee   : > { %v938_v24 = vmax.f32 %v922_v23, 0.0 }
 0x1f0   : > { %955 = vst [vmem:[%s2949_s23 + $0x50] sm:$0xff] %v938_v24 }
 0x1f1   : > { %v828_v25 = vpop.f32.mrf.mxu2 }
 0x1f2   : > { %v894_v27 = vadd.f32 %v893_v20, %v828_v25 }
 0x1f4   : > { %v923_v28 = vadd.f32 %v2945_v36, %v894_v27 }
 0x1f6   : > { %v939_v29 = vmax.f32 %v923_v28, 0.0 }
 0x1f8   : > { %956 = vst [vmem:[%s2949_s23 + $0x58] sm:$0xff] %v939_v29 }
 0x1f9   : > { %v831_v30 = vpop.f32.mrf.mxu2 }
 0x1fa   : > { %v897_v31 = vadd.f32 %v896_v26, %v831_v30 }
 0x1fc   : > { %v924_v33 = vadd.f32 %v2945_v36, %v897_v31 }
 0x1fe   : > { %v940_v34 = vmax.f32 %v924_v33, 0.0 }
 0x200   : > { %957 = vst [vmem:[%s2949_s23 + $0x60] sm:$0xff] %v940_v34 }
 0x201   : > { %v834_v35 = vpop.f32.mrf.mxu2 }
 0x202   : > { %v900_v37 = vadd.f32 %v899_v32, %v834_v35 }
 0x204   : > { %v925_v38 = vadd.f32 %v2945_v36, %v900_v37 }
 0x206   : > { %v941_v40 = vmax.f32 %v925_v38, 0.0 }
 0x208   : > { %958 = vst [vmem:[%s2949_s23 + $0x68] sm:$0xff] %v941_v40 }
 0x209   : > { %v837_v41 = vpop.f32.mrf.mxu2 }
 0x20a   : > { %v903_v42 = vadd.f32 %v902_v39, %v837_v41 }
 0x20c   : > { %v926_v43 = vadd.f32 %v2945_v36, %v903_v42 }
 0x20e   : > { %v942_v44 = vmax.f32 %v926_v43, 0.0 }
 0x210   : > { %959 = vst [vmem:[%s2949_s23 + $0x70] sm:$0xff] %v942_v44 }
 0x211   : > { %v840_v46 = vpop.f32.mrf.mxu2 }
 0x212   : > { %v906_v47 = vadd.f32 %v905_v45, %v840_v46 }
 0x214   : > { %v927_v48 = vadd.f32 %v2945_v36, %v906_v47  ;;  %963 = sbr.rel (%p1949_p7) target bundleno = 554 (0x22a), region = 104 }
 0x216   : > { %v943_v49 = vmax.f32 %v927_v48, 0.0 }
 0x218   : > { %960 = vst [vmem:[%s2949_s23 + $0x78] sm:$0xff] %v943_v49 }
 0x219   : > { %v2594_v50 = vmov 0.0  }
 0x21a   : > { %964 = vst [vmem:[%s2888_s24] sm:$0xff] %v2594_v50 }
 0x21b   : > { %965 = vst [vmem:[%s2888_s24 + $0x8] sm:$0xff] %v2594_v50 }
 0x21c   : > { %966 = vst [vmem:[%s2888_s24 + $0x10] sm:$0xff] %v2594_v50 }
 0x21d   : > { %967 = vst [vmem:[%s2888_s24 + $0x18] sm:$0xff] %v2594_v50 }
 0x21e   : > { %968 = vst [vmem:[%s2888_s24 + $0x20] sm:$0xff] %v2594_v50 }
 0x21f   : > { %969 = vst [vmem:[%s2888_s24 + $0x28] sm:$0xff] %v2594_v50 }
 0x220   : > { %970 = vst [vmem:[%s2888_s24 + $0x30] sm:$0xff] %v2594_v50 }
 0x221   : > { %971 = vst [vmem:[%s2888_s24 + $0x38] sm:$0xff] %v2594_v50 }
 0x222   : > { %972 = vst [vmem:[%s2888_s24 + $0x40] sm:$0xff] %v2594_v50 }
 0x223   : > { %973 = vst [vmem:[%s2888_s24 + $0x48] sm:$0xff] %v2594_v50 }
 0x224   : > { %974 = vst [vmem:[%s2888_s24 + $0x50] sm:$0xff] %v2594_v50 }
 0x225   : > { %975 = vst [vmem:[%s2888_s24 + $0x58] sm:$0xff] %v2594_v50 }
 0x226   : > { %976 = vst [vmem:[%s2888_s24 + $0x60] sm:$0xff] %v2594_v50 }
 0x227   : > { %977 = vst [vmem:[%s2888_s24 + $0x68] sm:$0xff] %v2594_v50 }
 0x228   : > { %978 = vst [vmem:[%s2888_s24 + $0x70] sm:$0xff] %v2594_v50 }
 0x229   : > { %979 = vst [vmem:[%s2888_s24 + $0x78] sm:$0xff] %v2594_v50 }
 0x22a PF: > { %s3457_s9 = sld [smem:[#allocation31_spill]] }
 0x230   : > { %p1950_p8 = scmp.le.s32.totalorder %s3457_s9, 0 }
 0x231   : > { %s984_s26 = scalar_lea.vmem (!%p1950_p8), [#allocation4], %s2878_s25 }
 0x232   : > { %983 = sbr.rel (%p1950_p8) target bundleno = 584 (0x248), region = 108 }
 0x237   : > { %v985_v36 = vld [vmem:[%s984_s26] sm:$0xff]  ;;  %v986_v51 = vld [vmem:[%s984_s26 + $0x8] sm:$0xff]  ;;  %v987_v52 = vld [vmem:[%s984_s26 + $0x10] sm:$0xff] }
 0x238   : > { %1001 = vst [vmem:[%s2888_s24] sm:$0xff] %v985_v36  ;;  %v988_v53 = vld [vmem:[%s984_s26 + $0x18] sm:$0xff]  ;;  %v989_v54 = vld [vmem:[%s984_s26 + $0x20] sm:$0xff]  ;;  %v990_v55 = vld [vmem:[%s984_s26 + $0x28] sm:$0xff] }
 0x239   : > { %1002 = vst [vmem:[%s2888_s24 + $0x8] sm:$0xff] %v986_v51  ;;  %v991_v56 = vld [vmem:[%s984_s26 + $0x30] sm:$0xff]  ;;  %v992_v57 = vld [vmem:[%s984_s26 + $0x38] sm:$0xff]  ;;  %v993_v58 = vld [vmem:[%s984_s26 + $0x40] sm:$0xff] }
 0x23a   : > { %1003 = vst [vmem:[%s2888_s24 + $0x10] sm:$0xff] %v987_v52  ;;  %v994_v59 = vld [vmem:[%s984_s26 + $0x48] sm:$0xff]  ;;  %v995_v60 = vld [vmem:[%s984_s26 + $0x50] sm:$0xff]  ;;  %v996_v61 = vld [vmem:[%s984_s26 + $0x58] sm:$0xff] }
 0x23b   : > { %1004 = vst [vmem:[%s2888_s24 + $0x18] sm:$0xff] %v988_v53  ;;  %v997_v62 = vld [vmem:[%s984_s26 + $0x60] sm:$0xff]  ;;  %v998_v63 = vld [vmem:[%s984_s26 + $0x68] sm:$0xff]  ;;  %v999_v0 = vld [vmem:[%s984_s26 + $0x70] sm:$0xff] }
 0x23c   : > { %1005 = vst [vmem:[%s2888_s24 + $0x20] sm:$0xff] %v989_v54  ;;  %v1000_v1 = vld [vmem:[%s984_s26 + $0x78] sm:$0xff] }
 0x23d   : > { %1006 = vst [vmem:[%s2888_s24 + $0x28] sm:$0xff] %v990_v55 }
 0x23e   : > { %1007 = vst [vmem:[%s2888_s24 + $0x30] sm:$0xff] %v991_v56 }
 0x23f   : > { %1008 = vst [vmem:[%s2888_s24 + $0x38] sm:$0xff] %v992_v57 }
 0x240   : > { %1009 = vst [vmem:[%s2888_s24 + $0x40] sm:$0xff] %v993_v58 }
 0x241   : > { %1010 = vst [vmem:[%s2888_s24 + $0x48] sm:$0xff] %v994_v59 }
 0x242   : > { %1011 = vst [vmem:[%s2888_s24 + $0x50] sm:$0xff] %v995_v60 }
 0x243   : > { %1012 = vst [vmem:[%s2888_s24 + $0x58] sm:$0xff] %v996_v61 }
 0x244   : > { %1013 = vst [vmem:[%s2888_s24 + $0x60] sm:$0xff] %v997_v62 }
 0x245   : > { %1014 = vst [vmem:[%s2888_s24 + $0x68] sm:$0xff] %v998_v63 }
 0x246   : > { %1015 = vst [vmem:[%s2888_s24 + $0x70] sm:$0xff] %v999_v0 }
 0x247   : > { %1016 = vst [vmem:[%s2888_s24 + $0x78] sm:$0xff] %v1000_v1 }
 0x248 PF: > { %s3458_s15 = sld [smem:[#allocation30_spill]] }
 0x24e   : > { %p1951_p9 = scmp.ne.s32.totalorder %s3458_s15, 1 }
 0x24f   : > { %s3051_s0 = scalar_lea.vmem (!%p1951_p9), [#allocation3], %s2878_s25  ;;  %s3459_s14 = sld [smem:[#allocation44_spill]] (!%p1951_p9) }
 0x250   : > { %1020 = sbr.rel (%p1951_p9) target bundleno = 1218 (0x4c2), region = 112  ;;  %s3460_s11 = sld [smem:[#allocation47_spill]] (!%p1951_p9) }
 0x251   : > { %s3163_s13 = scalar_lea.vmem (!%p1951_p9), [#allocation2], %s2878_s25  ;;  %s3461_s4 = sld [smem:[#allocation31_spill]] (!%p1951_p9) }
 0x255   : > { %v1068_v2 = vld [vmem:[#allocation3 + $0x78] sm:$0xff]  ;;  %v1067_v4 = vld [vmem:[#allocation3 + $0x70] sm:$0xff]  ;;  %v1066_v6 = vld [vmem:[#allocation3 + $0x68] sm:$0xff] }
 0x256   : > { %v1084_v3 = vld [vmem:[#allocation3 + $0xf8] sm:$0xff]  ;;  %1085 = vmatpush.msra.mxu0 %v1068_v2  ;;  %v1083_v5 = vld [vmem:[#allocation3 + $0xf0] sm:$0xff]  ;;  %v1082_v7 = vld [vmem:[#allocation3 + $0xe8] sm:$0xff]  ;;  %1962 = vmatpush.msra.mxu2 %v1068_v2 }
 0x257   : > { %1150 = vmatpush.msra.mxu1 %v1084_v3  ;;  %1978 = vmatpush.msra.mxu3 %v1084_v3  ;;  %v1065_v8 = vld [vmem:[#allocation3 + $0x60] sm:$0xff]  ;;  %v1064_v10 = vld [vmem:[#allocation3 + $0x58] sm:$0xff]  ;;  %v1063_v12 = vld [vmem:[#allocation3 + $0x50] sm:$0xff]  ;;  %p1952_p11 = scmp.ne.s32.totalorder %s3461_s4, 0 }
 0x258   : > { %1086 = vmatpush.msra.mxu0 %v1067_v4  ;;  %v1081_v9 = vld [vmem:[#allocation3 + $0xe0] sm:$0xff]  ;;  %1963 = vmatpush.msra.mxu2 %v1067_v4  ;;  %v1080_v11 = vld [vmem:[#allocation3 + $0xd8] sm:$0xff]  ;;  %v1079_v13 = vld [vmem:[#allocation3 + $0xd0] sm:$0xff]  ;;  %s1632_s3 = scalar_lea.vmem (!%p1952_p11), [#allocation4], %s2878_s25 }
 0x259   : > { %1151 = vmatpush.msra.mxu1 %v1083_v5  ;;  %1979 = vmatpush.msra.mxu3 %v1083_v5  ;;  %v1062_v14 = vld [vmem:[#allocation3 + $0x48] sm:$0xff]  ;;  %v1061_v16 = vld [vmem:[#allocation3 + $0x40] sm:$0xff]  ;;  %v1060_v18 = vld [vmem:[#allocation3 + $0x38] sm:$0xff] }
 0x25a   : > { %1087 = vmatpush.msra.mxu0 %v1066_v6  ;;  %1964 = vmatpush.msra.mxu2 %v1066_v6  ;;  %v1078_v15 = vld [vmem:[#allocation3 + $0xc8] sm:$0xff]  ;;  %v1077_v17 = vld [vmem:[#allocation3 + $0xc0] sm:$0xff]  ;;  %v1076_v19 = vld [vmem:[#allocation3 + $0xb8] sm:$0xff] }
 0x25b   : > { %1152 = vmatpush.msra.mxu1 %v1082_v7  ;;  %1980 = vmatpush.msra.mxu3 %v1082_v7  ;;  %v1059_v20 = vld [vmem:[#allocation3 + $0x30] sm:$0xff]  ;;  %v1058_v22 = vld [vmem:[#allocation3 + $0x28] sm:$0xff]  ;;  %v1057_v24 = vld [vmem:[#allocation3 + $0x20] sm:$0xff] }
 0x25c   : > { %1088 = vmatpush.msra.mxu0 %v1065_v8  ;;  %1965 = vmatpush.msra.mxu2 %v1065_v8  ;;  %v1075_v21 = vld [vmem:[#allocation3 + $0xb0] sm:$0xff]  ;;  %v1074_v23 = vld [vmem:[#allocation3 + $0xa8] sm:$0xff]  ;;  %v1073_v25 = vld [vmem:[#allocation3 + $0xa0] sm:$0xff] }
 0x25d   : > { %1153 = vmatpush.msra.mxu1 %v1081_v9  ;;  %1981 = vmatpush.msra.mxu3 %v1081_v9  ;;  %v1056_v26 = vld [vmem:[#allocation3 + $0x18] sm:$0xff]  ;;  %v1055_v28 = vld [vmem:[#allocation3 + $0x10] sm:$0xff]  ;;  %v1054_v30 = vld [vmem:[#allocation3 + $0x8] sm:$0xff] }
 0x25e   : > { %1089 = vmatpush.msra.mxu0 %v1064_v10  ;;  %1966 = vmatpush.msra.mxu2 %v1064_v10  ;;  %v1072_v27 = vld [vmem:[#allocation3 + $0x98] sm:$0xff]  ;;  %v1071_v29 = vld [vmem:[#allocation3 + $0x90] sm:$0xff]  ;;  %v1070_v31 = vld [vmem:[#allocation3 + $0x88] sm:$0xff] }
 0x25f   : > { %1154 = vmatpush.msra.mxu1 %v1080_v11  ;;  %1982 = vmatpush.msra.mxu3 %v1080_v11  ;;  %v1053_v32 = vld [vmem:[#allocation3] sm:$0xff]  ;;  %v1022_v35 = vld [vmem:[%s2858_s30 + $0x8] sm:$0xff]  ;;  %v1023_v37 = vld [vmem:[%s2858_s30 + $0x10] sm:$0xff] }
 0x260   : > { %1090 = vmatpush.msra.mxu0 %v1063_v12  ;;  %1967 = vmatpush.msra.mxu2 %v1063_v12  ;;  %v1069_v33 = vld [vmem:[#allocation3 + $0x80] sm:$0xff]  ;;  %v1024_v38 = vld [vmem:[%s2858_s30 + $0x18] sm:$0xff]  ;;  %v1026_v40 = vld [vmem:[%s2858_s30 + $0x28] sm:$0xff] }
 0x261   : > { %1155 = vmatpush.msra.mxu1 %v1079_v13  ;;  %1983 = vmatpush.msra.mxu3 %v1079_v13  ;;  %v1021_v34 = vld [vmem:[%s2858_s30] sm:$0xff]  ;;  %v1027_v41 = vld [vmem:[%s2858_s30 + $0x30] sm:$0xff]  ;;  %v1028_v42 = vld [vmem:[%s2858_s30 + $0x38] sm:$0xff] }
 0x262   : > { %1091 = vmatpush.msra.mxu0 %v1062_v14  ;;  %1968 = vmatpush.msra.mxu2 %v1062_v14  ;;  %v1025_v39 = vld [vmem:[%s2858_s30 + $0x20] sm:$0xff]  ;;  %v1038_v44 = vld [vmem:[%s2858_s30 + $0x88] sm:$0xff]  ;;  %v1263_v45 = vld [vmem:[#allocation14 + $0x78] sm:$0xff] }
 0x263   : > { %1156 = vmatpush.msra.mxu1 %v1078_v15  ;;  %1984 = vmatpush.msra.mxu3 %v1078_v15  ;;  %v1037_v43 = vld [vmem:[%s2858_s30 + $0x80] sm:$0xff]  ;;  %v1247_v46 = vld [vmem:[#allocation12 + $0x78] sm:$0xff]  ;;  %v1262_v47 = vld [vmem:[#allocation14 + $0x70] sm:$0xff] }
 0x264   : > { %1092 = vmatpush.msra.mxu0 %v1061_v16  ;;  %1969 = vmatpush.msra.mxu2 %v1061_v16  ;;  %v1246_v48 = vld [vmem:[#allocation12 + $0x70] sm:$0xff]  ;;  %v1261_v49 = vld [vmem:[#allocation14 + $0x68] sm:$0xff]  ;;  %v1029_v36 = vld [vmem:[%s2858_s30 + $0x40] sm:$0xff] }
 0x265   : > { %1157 = vmatpush.msra.mxu1 %v1077_v17  ;;  %1985 = vmatpush.msra.mxu3 %v1077_v17  ;;  %v1245_v50 = vld [vmem:[#allocation12 + $0x68] sm:$0xff]  ;;  %v1039_v52 = vld [vmem:[%s2858_s30 + $0x90] sm:$0xff]  ;;  %v1040_v53 = vld [vmem:[%s2858_s30 + $0x98] sm:$0xff] }
 0x266   : > { %1093 = vmatpush.msra.mxu0 %v1060_v18  ;;  %1970 = vmatpush.msra.mxu2 %v1060_v18  ;;  %v1030_v51 = vld [vmem:[%s2858_s30 + $0x48] sm:$0xff]  ;;  %v1260_v54 = vld [vmem:[#allocation14 + $0x60] sm:$0xff]  ;;  %v1259_v56 = vld [vmem:[#allocation14 + $0x58] sm:$0xff] }
 0x267   : > { %1158 = vmatpush.msra.mxu1 %v1076_v19  ;;  %1986 = vmatpush.msra.mxu3 %v1076_v19  ;;  %v1244_v55 = vld [vmem:[#allocation12 + $0x60] sm:$0xff]  ;;  %v1243_v57 = vld [vmem:[#allocation12 + $0x58] sm:$0xff]  ;;  %v1258_v58 = vld [vmem:[#allocation14 + $0x50] sm:$0xff] }
 0x268   : > { %1094 = vmatpush.msra.mxu0 %v1059_v20  ;;  %1971 = vmatpush.msra.mxu2 %v1059_v20  ;;  %v1242_v59 = vld [vmem:[#allocation12 + $0x50] sm:$0xff]  ;;  %v1032_v61 = vld [vmem:[%s2858_s30 + $0x58] sm:$0xff]  ;;  %v1041_v62 = vld [vmem:[%s2858_s30 + $0xa0] sm:$0xff] }
 0x269   : > { %1159 = vmatpush.msra.mxu1 %v1075_v21  ;;  %1987 = vmatpush.msra.mxu3 %v1075_v21  ;;  %v1031_v60 = vld [vmem:[%s2858_s30 + $0x50] sm:$0xff]  ;;  %v1042_v63 = vld [vmem:[%s2858_s30 + $0xa8] sm:$0xff]  ;;  %v1256_v2 = vld [vmem:[#allocation14 + $0x40] sm:$0xff] }
 0x26a   : > { %1095 = vmatpush.msra.mxu0 %v1058_v22  ;;  %1972 = vmatpush.msra.mxu2 %v1058_v22  ;;  %v1257_v0 = vld [vmem:[#allocation14 + $0x48] sm:$0xff]  ;;  %v1240_v3 = vld [vmem:[#allocation12 + $0x40] sm:$0xff]  ;;  %v1255_v4 = vld [vmem:[#allocation14 + $0x38] sm:$0xff] }
 0x26b   : > { %1160 = vmatpush.msra.mxu1 %v1074_v23  ;;  %1988 = vmatpush.msra.mxu3 %v1074_v23  ;;  %v1241_v1 = vld [vmem:[#allocation12 + $0x48] sm:$0xff]  ;;  %v1239_v5 = vld [vmem:[#allocation12 + $0x38] sm:$0xff]  ;;  %v1033_v6 = vld [vmem:[%s2858_s30 + $0x60] sm:$0xff] }
 0x26c   : > { %1096 = vmatpush.msra.mxu0 %v1057_v24  ;;  %1973 = vmatpush.msra.mxu2 %v1057_v24  ;;  %v1034_v7 = vld [vmem:[%s2858_s30 + $0x68] sm:$0xff]  ;;  %v1043_v8 = vld [vmem:[%s2858_s30 + $0xb0] sm:$0xff]  ;;  %v1044_v9 = vld [vmem:[%s2858_s30 + $0xb8] sm:$0xff] }
 0x26d   : > { %1161 = vmatpush.msra.mxu1 %v1073_v25  ;;  %1989 = vmatpush.msra.mxu3 %v1073_v25  ;;  %v1254_v10 = vld [vmem:[#allocation14 + $0x30] sm:$0xff]  ;;  %v1253_v12 = vld [vmem:[#allocation14 + $0x28] sm:$0xff]  ;;  %v1252_v14 = vld [vmem:[#allocation14 + $0x20] sm:$0xff] }
 0x26e   : > { %1097 = vmatpush.msra.mxu0 %v1056_v26  ;;  %1974 = vmatpush.msra.mxu2 %v1056_v26  ;;  %v1238_v11 = vld [vmem:[#allocation12 + $0x30] sm:$0xff]  ;;  %v1237_v13 = vld [vmem:[#allocation12 + $0x28] sm:$0xff]  ;;  %v1236_v15 = vld [vmem:[#allocation12 + $0x20] sm:$0xff] }
 0x26f   : > { %1162 = vmatpush.msra.mxu1 %v1072_v27  ;;  %1990 = vmatpush.msra.mxu3 %v1072_v27  ;;  %v1035_v16 = vld [vmem:[%s2858_s30 + $0x70] sm:$0xff]  ;;  %v1036_v17 = vld [vmem:[%s2858_s30 + $0x78] sm:$0xff]  ;;  %v1045_v18 = vld [vmem:[%s2858_s30 + $0xc0] sm:$0xff] }
 0x270   : > { %1098 = vmatpush.msra.mxu0 %v1055_v28  ;;  %1975 = vmatpush.msra.mxu2 %v1055_v28  ;;  %v1046_v19 = vld [vmem:[%s2858_s30 + $0xc8] sm:$0xff]  ;;  %v1251_v20 = vld [vmem:[#allocation14 + $0x18] sm:$0xff]  ;;  %v1250_v22 = vld [vmem:[#allocation14 + $0x10] sm:$0xff] }
 0x271   : > { %1163 = vmatpush.msra.mxu1 %v1071_v29  ;;  %1991 = vmatpush.msra.mxu3 %v1071_v29  ;;  %v1235_v21 = vld [vmem:[#allocation12 + $0x18] sm:$0xff]  ;;  %v1234_v23 = vld [vmem:[#allocation12 + $0x10] sm:$0xff]  ;;  %v1249_v24 = vld [vmem:[#allocation14 + $0x8] sm:$0xff] }
 0x272   : > { %1099 = vmatpush.msra.mxu0 %v1054_v30  ;;  %1976 = vmatpush.msra.mxu2 %v1054_v30  ;;  %v1233_v25 = vld [vmem:[#allocation12 + $0x8] sm:$0xff]  ;;  %v1248_v26 = vld [vmem:[#allocation14] sm:$0xff]  ;;  %v1047_v28 = vld [vmem:[%s2858_s30 + $0xd0] sm:$0xff] }
 0x273   : > { %1164 = vmatpush.msra.mxu1 %v1070_v31  ;;  %1992 = vmatpush.msra.mxu3 %v1070_v31  ;;  %v1232_v27 = vld [vmem:[#allocation12] sm:$0xff]  ;;  %v1048_v29 = vld [vmem:[%s2858_s30 + $0xd8] sm:$0xff]  ;;  %v1050_v31 = vld [vmem:[%s2858_s30 + $0xe8] sm:$0xff] }
 0x274   : > { %1100 = vmatpush.msra.mxu0 %v1053_v32  ;;  %1977 = vmatpush.msra.mxu2 %v1053_v32  ;;  %v1049_v30 = vld [vmem:[%s2858_s30 + $0xe0] sm:$0xff]  ;;  %v1051_v32 = vld [vmem:[%s2858_s30 + $0xf0] sm:$0xff] }
 0x275   : > { %1165 = vmatpush.msra.mxu1 %v1069_v33  ;;  %1101 = vmatmul.f32.vlgmr.msra.gmra.mxu0 %v1021_v34  ;;  %v3054_v34 = vld [vmem:[%s3051_s0] sm:$0xff] }
 0x276   : > { %1166 = vmatmul.f32.vlgmr.msra.gmra.mxu1 %v1022_v35  ;;  %1993 = vmatpush.msra.mxu3 %v1069_v33  ;;  %v1052_v33 = vld [vmem:[%s2858_s30 + $0xf8] sm:$0xff]  ;;  %v3058_v35 = vld [vmem:[%s3051_s0 + $0x8] sm:$0xff] }
 0x277   : > { %1125 = vmatmul.f32.vlgmr.msra.gmra.mxu2 %v1037_v43  ;;  %1190 = vmatmul.f32.vlgmr.msra.gmra.mxu3 %v1038_v44 }
 0x278   : > { %1264 = vmatpush.msrb.mxu2 %v1263_v45  ;;  %1329 = vmatpush.msrb.mxu3 %v1247_v46  ;;  %v3074_v46 = vld [vmem:[%s3051_s0 + $0x28] sm:$0xff] }
 0x27a   : > { %1265 = vmatpush.msrb.mxu2 %v1262_v47  ;;  %1330 = vmatpush.msrb.mxu3 %v1246_v48 }
 0x27c   : > { %1266 = vmatpush.msrb.mxu2 %v1261_v49  ;;  %1331 = vmatpush.msrb.mxu3 %v1245_v50  ;;  %v3078_v50 = vld [vmem:[%s3051_s0 + $0x30] sm:$0xff] }
 0x27d   : > { %1104 = vmatmul.f32.gmra.mxu0 %v1023_v37  ;;  %v3062_v37 = vld [vmem:[%s3051_s0 + $0x10] sm:$0xff] }
 0x27e   : > { %1169 = vmatmul.f32.gmra.mxu1 %v1024_v38  ;;  %1267 = vmatpush.msrb.mxu2 %v1260_v54  ;;  %v3066_v38 = vld [vmem:[%s3051_s0 + $0x18] sm:$0xff] }
 0x27f   : > { %1128 = vmatmul.f32.gmra.mxu2 %v1039_v52  ;;  %1193 = vmatmul.f32.gmra.mxu3 %v1040_v53  ;;  %v3082_v53 = vld [vmem:[%s3051_s0 + $0x38] sm:$0xff] }
 0x280   : > { %1332 = vmatpush.msrb.mxu3 %v1244_v55  ;;  %1268 = vmatpush.msrb.mxu2 %v1259_v56 }
 0x282   : > { %1333 = vmatpush.msrb.mxu3 %v1243_v57  ;;  %1269 = vmatpush.msrb.mxu2 %v1258_v58  ;;  %v3086_v58 = vld [vmem:[%s3051_s0 + $0x40] sm:$0xff] }
 0x284   : > { %1334 = vmatpush.msrb.mxu3 %v1242_v59  ;;  %1270 = vmatpush.msrb.mxu2 %v1257_v0  ;;  %v1461_v0 = vld [vmem:[#allocation17 + $0x78] sm:$0xff] }
 0x285   : > { %1107 = vmatmul.f32.gmra.mxu0 %v1025_v39 }
 0x286   : > { %1172 = vmatmul.f32.gmra.mxu1 %v1026_v40  ;;  %1335 = vmatpush.msrb.mxu3 %v1241_v1  ;;  %v1445_v1 = vld [vmem:[#allocation15 + $0x78] sm:$0xff] }
 0x287   : > { %1131 = vmatmul.f32.gmra.mxu2 %v1041_v62  ;;  %1196 = vmatmul.f32.gmra.mxu3 %v1042_v63  ;;  %v3090_v63 = vld [vmem:[%s3051_s0 + $0x48] sm:$0xff] }
 0x288   : > { %1271 = vmatpush.msrb.mxu2 %v1256_v2  ;;  %1336 = vmatpush.msrb.mxu3 %v1240_v3  ;;  %v1460_v2 = vld [vmem:[#allocation17 + $0x70] sm:$0xff] }
 0x289   : > { %1462 = vmatpush.msrb.mxu0 %v1461_v0  ;;  %1527 = vmatpush.msrb.mxu1 %v1445_v1  ;;  %v1444_v3 = vld [vmem:[#allocation15 + $0x70] sm:$0xff]  ;;  %v1447_v0 = vld [vmem:[#allocation17 + $0x8] sm:$0xff] }
 0x28a   : > { %1272 = vmatpush.msrb.mxu2 %v1255_v4  ;;  %1337 = vmatpush.msrb.mxu3 %v1239_v5  ;;  %v1431_v1 = vld [vmem:[#allocation15 + $0x8] sm:$0xff] }
 0x28b   : > { %1463 = vmatpush.msrb.mxu0 %v1460_v2  ;;  %1528 = vmatpush.msrb.mxu1 %v1444_v3 }
 0x28c   : > { %1273 = vmatpush.msrb.mxu2 %v1254_v10  ;;  %1338 = vmatpush.msrb.mxu3 %v1238_v11  ;;  %v1459_v10 = vld [vmem:[#allocation17 + $0x68] sm:$0xff] }
 0x28d   : > { %1110 = vmatmul.f32.gmra.mxu0 %v1027_v41  ;;  %v1443_v11 = vld [vmem:[#allocation15 + $0x68] sm:$0xff] }
 0x28e   : > { %1175 = vmatmul.f32.gmra.mxu1 %v1028_v42  ;;  %1274 = vmatpush.msrb.mxu2 %v1253_v12  ;;  %v3070_v42 = vld [vmem:[%s3051_s0 + $0x20] sm:$0xff] }
 0x28f   : > { %1134 = vmatmul.f32.gmra.mxu2 %v1043_v8  ;;  %1199 = vmatmul.f32.gmra.mxu3 %v1044_v9  ;;  %v3094_v9 = vld [vmem:[%s3051_s0 + $0x50] sm:$0xff]  ;;  %v1458_v12 = vld [vmem:[#allocation17 + $0x60] sm:$0xff] }
 0x290   : > { %1339 = vmatpush.msrb.mxu3 %v1237_v13  ;;  %1275 = vmatpush.msrb.mxu2 %v1252_v14  ;;  %v1442_v13 = vld [vmem:[#allocation15 + $0x60] sm:$0xff] }
 0x291   : > { %1464 = vmatpush.msrb.mxu0 %v1459_v10  ;;  %1529 = vmatpush.msrb.mxu1 %v1443_v11  ;;  %v1430_v10 = vld [vmem:[#allocation15] sm:$0xff] }
 0x292   : > { %1340 = vmatpush.msrb.mxu3 %v1236_v15  ;;  %1276 = vmatpush.msrb.mxu2 %v1251_v20  ;;  %v1457_v20 = vld [vmem:[#allocation17 + $0x58] sm:$0xff] }
 0x293   : > { %1465 = vmatpush.msrb.mxu0 %v1458_v12  ;;  %1530 = vmatpush.msrb.mxu1 %v1442_v13 }
 0x294   : > { %1341 = vmatpush.msrb.mxu3 %v1235_v21  ;;  %1277 = vmatpush.msrb.mxu2 %v1250_v22  ;;  %v1441_v21 = vld [vmem:[#allocation15 + $0x58] sm:$0xff]  ;;  %v1456_v22 = vld [vmem:[#allocation17 + $0x50] sm:$0xff] }
 0x295   : > { %1113 = vmatmul.f32.gmra.mxu0 %v1029_v36  ;;  %1531 = vmatpush.msrb.mxu1 %v1441_v21 }
 0x296   : > { %1178 = vmatmul.f32.gmra.mxu1 %v1030_v51  ;;  %1342 = vmatpush.msrb.mxu3 %v1234_v23  ;;  %v1440_v23 = vld [vmem:[#allocation15 + $0x50] sm:$0xff] }
 0x297   : > { %1137 = vmatmul.f32.gmra.mxu2 %v1045_v18  ;;  %1202 = vmatmul.f32.gmra.mxu3 %v1046_v19  ;;  %v3098_v19 = vld [vmem:[%s3051_s0 + $0x58] sm:$0xff] }
 0x298   : > { %1278 = vmatpush.msrb.mxu2 %v1249_v24  ;;  %1343 = vmatpush.msrb.mxu3 %v1233_v25 }
 0x299   : > { %1466 = vmatpush.msrb.mxu0 %v1457_v20  ;;  %1532 = vmatpush.msrb.mxu1 %v1440_v23 }
 0x29a   : > { %1279 = vmatpush.msrb.mxu2 %v1248_v26  ;;  %1344 = vmatpush.msrb.mxu3 %v1232_v27  ;;  %v3102_v27 = vld [vmem:[%s3051_s0 + $0x60] sm:$0xff] }
 0x29b   : > { %1467 = vmatpush.msrb.mxu0 %v1456_v22 }
 0x29d   : > { %1116 = vmatmul.f32.gmra.mxu0 %v1031_v60 }
 0x29e   : > { %1181 = vmatmul.f32.gmra.mxu1 %v1032_v61 }
 0x29f   : > { %1140 = vmatmul.f32.gmra.mxu2 %v1047_v28  ;;  %1205 = vmatmul.f32.gmra.mxu3 %v1048_v29  ;;  %v1455_v28 = vld [vmem:[#allocation17 + $0x48] sm:$0xff] }
 0x2a0   : > { %v1439_v29 = vld [vmem:[#allocation15 + $0x48] sm:$0xff]  ;;  %1468 = vmatpush.msrb.mxu0 %v1455_v28 }
 0x2a1   : > { %1533 = vmatpush.msrb.mxu1 %v1439_v29 }
 0x2a5   : > { %1119 = vmatmul.f32.gmra.mxu0 %v1033_v6 }
 0x2a6   : > { %1184 = vmatmul.f32.gmra.mxu1 %v1034_v7 }
 0x2a7   : > { %1143 = vmatmul.f32.gmra.mxu2 %v1049_v30  ;;  %1208 = vmatmul.f32.gmra.mxu3 %v1050_v31  ;;  %v1454_v30 = vld [vmem:[#allocation17 + $0x40] sm:$0xff] }
 0x2a8   : > { %v1438_v31 = vld [vmem:[#allocation15 + $0x40] sm:$0xff]  ;;  %1469 = vmatpush.msrb.mxu0 %v1454_v30 }
 0x2a9   : > { %1534 = vmatpush.msrb.mxu1 %v1438_v31 }
 0x2ad   : > { %1122 = vmatmul.f32.gmra.mxu0 %v1035_v16 }
 0x2ae   : > { %1187 = vmatmul.f32.gmra.mxu1 %v1036_v17 }
 0x2af   : > { %1146 = vmatmul.f32.gmra.mxu2 %v1051_v32  ;;  %1211 = vmatmul.f32.gmra.mxu3 %v1052_v33 }
 0x2b7   : > { %1345 = vmatmul.f32.vlgmr.msrb.gmra.mxu3 %v3054_v34 }
 0x2bf   : > { %1348 = vmatmul.f32.gmra.mxu3 %v3058_v35 }
 0x2c7   : > { %1351 = vmatmul.f32.gmra.mxu3 %v3062_v37 }
 0x2cf   : > { %1354 = vmatmul.f32.gmra.mxu3 %v3066_v38 }
 0x2d7   : > { %1357 = vmatmul.f32.gmra.mxu3 %v3070_v42 }
 0x2df   : > { %1360 = vmatmul.f32.gmra.mxu3 %v3074_v46 }
 0x2e7   : > { %1363 = vmatmul.f32.gmra.mxu3 %v3078_v50 }
 0x2ef   : > { %1366 = vmatmul.f32.gmra.mxu3 %v3082_v53 }
 0x2f2   : > { %v1102_v39 = vpop.f32.mrf.mxu0 }
 0x2f3   : > { %v1167_v40 = vpop.f32.mrf.mxu1 }
 0x2f4   : > { %v1168_v41 = vadd.f32 %v1167_v40, %v1102_v39  ;;  %v3106_v39 = vld [vmem:[%s3051_s0 + $0x68] sm:$0xff]  ;;  %v1453_v40 = vld [vmem:[#allocation17 + $0x38] sm:$0xff] }
 0x2f5   : > { %1470 = vmatpush.msrb.mxu0 %v1453_v40 }
 0x2f6   : > { %1280 = vmatmul.f32.vlgmr.msrb.gmra.mxu2 %v1168_v41  ;;  %v1437_v41 = vld [vmem:[#allocation15 + $0x38] sm:$0xff] }
 0x2f7   : > { %1369 = vmatmul.f32.gmra.mxu3 %v3086_v58  ;;  %1535 = vmatpush.msrb.mxu1 %v1437_v41 }
 0x2fa   : > { %v1105_v43 = vpop.f32.mrf.mxu0  ;;  %v1191_v54 = vpop.f32.mrf.mxu3 }
 0x2fb   : > { %v1170_v44 = vpop.f32.mrf.mxu1  ;;  %v1126_v4 = vpop.f32.mrf.mxu2 }
 0x2fc   : > { %v1171_v45 = vadd.f32 %v1170_v44, %v1105_v43  ;;  %v1192_v24 = vadd.f32 %v1191_v54, %v1126_v4  ;;  %v1452_v43 = vld [vmem:[#allocation17 + $0x30] sm:$0xff]  ;;  %v1434_v54 = vld [vmem:[#allocation15 + $0x20] sm:$0xff] }
 0x2fd   : > { %1471 = vmatpush.msrb.mxu0 %v1452_v43 }
 0x2fe   : > { %1283 = vmatmul.f32.gmra.mxu2 %v1171_v45  ;;  %v1436_v45 = vld [vmem:[#allocation15 + $0x30] sm:$0xff] }
 0x2ff   : > { %1372 = vmatmul.f32.gmra.mxu3 %v3090_v63  ;;  %1536 = vmatpush.msrb.mxu1 %v1436_v45 }
 0x302   : > { %v1108_v47 = vpop.f32.mrf.mxu0  ;;  %v1194_v59 = vpop.f32.mrf.mxu3 }
 0x303   : > { %v1173_v48 = vpop.f32.mrf.mxu1  ;;  %v1129_v14 = vpop.f32.mrf.mxu2 }
 0x304   : > { %v1174_v49 = vadd.f32 %v1173_v48, %v1108_v47  ;;  %v1195_v32 = vadd.f32 %v1194_v59, %v1129_v14  ;;  %v3110_v48 = vld [vmem:[%s3051_s0 + $0x70] sm:$0xff]  ;;  %v1449_v59 = vld [vmem:[#allocation17 + $0x18] sm:$0xff] }
 0x306   : > { %1286 = vmatmul.f32.gmra.mxu2 %v1174_v49  ;;  %v1451_v49 = vld [vmem:[#allocation17 + $0x28] sm:$0xff] }
 0x307   : > { %1375 = vmatmul.f32.gmra.mxu3 %v3094_v9  ;;  %1472 = vmatpush.msrb.mxu0 %v1451_v49 }
 0x30a   : > { %v1111_v36 = vpop.f32.mrf.mxu0  ;;  %v1197_v5 = vpop.f32.mrf.mxu3 }
 0x30b   : > { %v1176_v51 = vpop.f32.mrf.mxu1  ;;  %v1132_v26 = vpop.f32.mrf.mxu2 }
 0x30c   : > { %v1177_v52 = vadd.f32 %v1176_v51, %v1111_v36  ;;  %v1198_v47 = vadd.f32 %v1197_v5, %v1132_v26  ;;  %v1435_v36 = vld [vmem:[#allocation15 + $0x28] sm:$0xff]  ;;  %v1450_v51 = vld [vmem:[#allocation17 + $0x20] sm:$0xff] }
 0x30d   : > { %1537 = vmatpush.msrb.mxu1 %v1435_v36  ;;  %1473 = vmatpush.msrb.mxu0 %v1450_v51 }
 0x30e   : > { %1289 = vmatmul.f32.gmra.mxu2 %v1177_v52 }
 0x30f   : > { %1378 = vmatmul.f32.gmra.mxu3 %v3098_v19  ;;  %1538 = vmatpush.msrb.mxu1 %v1434_v54 }
 0x310   : > { %1474 = vmatpush.msrb.mxu0 %v1449_v59 }
 0x312   : > { %v1114_v55 = vpop.f32.mrf.mxu0  ;;  %v1200_v15 = vpop.f32.mrf.mxu3 }
 0x313   : > { %v1179_v56 = vpop.f32.mrf.mxu1  ;;  %v1135_v44 = vpop.f32.mrf.mxu2 }
 0x314   : > { %v1180_v57 = vadd.f32 %v1179_v56, %v1114_v55  ;;  %v1201_v56 = vadd.f32 %v1200_v15, %v1135_v44 }
 0x316   : > { %1292 = vmatmul.f32.gmra.mxu2 %v1180_v57  ;;  %v3114_v57 = vld [vmem:[%s3051_s0 + $0x78] sm:$0xff] }
 0x317   : > { %1381 = vmatmul.f32.gmra.mxu3 %v3102_v27 }
 0x31a   : > { %v1117_v60 = vpop.f32.mrf.mxu0  ;;  %v1203_v25 = vpop.f32.mrf.mxu3 }
 0x31b   : > { %v1182_v61 = vpop.f32.mrf.mxu1  ;;  %v1138_v55 = vpop.f32.mrf.mxu2 }
 0x31c   : > { %v1183_v62 = vadd.f32 %v1182_v61, %v1117_v60  ;;  %v1433_v60 = vld [vmem:[#allocation15 + $0x18] sm:$0xff]  ;;  %v1448_v61 = vld [vmem:[#allocation17 + $0x10] sm:$0xff]  ;;  %v1204_v3 = vadd.f32 %v1203_v25, %v1138_v55 }
 0x31d   : > { %1539 = vmatpush.msrb.mxu1 %v1433_v60  ;;  %1475 = vmatpush.msrb.mxu0 %v1448_v61 }
 0x31e   : > { %1295 = vmatmul.f32.gmra.mxu2 %v1183_v62  ;;  %v1432_v62 = vld [vmem:[#allocation15 + $0x10] sm:$0xff] }
 0x31f   : > { %1384 = vmatmul.f32.gmra.mxu3 %v3106_v39  ;;  %1540 = vmatpush.msrb.mxu1 %v1432_v62 }
 0x320   : > { %1476 = vmatpush.msrb.mxu0 %v1447_v0 }
 0x321   : > { %1541 = vmatpush.msrb.mxu1 %v1431_v1 }
 0x322   : > { %v1120_v6 = vpop.f32.mrf.mxu0  ;;  %v1206_v33 = vpop.f32.mrf.mxu3 }
 0x323   : > { %v1185_v7 = vpop.f32.mrf.mxu1  ;;  %v1141_v4 = vpop.f32.mrf.mxu2  ;;  %1542 = vmatpush.msrb.mxu1 %v1430_v10 }
 0x324   : > { %v1186_v8 = vadd.f32 %v1185_v7, %v1120_v6  ;;  %v1207_v6 = vadd.f32 %v1206_v33, %v1141_v4  ;;  %1543 = vmatmul.f32.vlgmr.msrb.gmra.mxu1 %v3054_v34 }
 0x326   : > { %1298 = vmatmul.f32.gmra.mxu2 %v1186_v8  ;;  %v1446_v8 = vld [vmem:[#allocation17] sm:$0xff] }
 0x327   : > { %1387 = vmatmul.f32.gmra.mxu3 %v3110_v48  ;;  %1477 = vmatpush.msrb.mxu0 %v1446_v8 }
 0x32a   : > { %v1123_v16 = vpop.f32.mrf.mxu0  ;;  %v1209_v52 = vpop.f32.mrf.mxu3 }
 0x32b   : > { %v1188_v17 = vpop.f32.mrf.mxu1  ;;  %v1144_v7 = vpop.f32.mrf.mxu2 }
 0x32c   : > { %v1189_v18 = vadd.f32 %v1188_v17, %v1123_v16  ;;  %v1210_v11 = vadd.f32 %v1209_v52, %v1144_v7  ;;  %1546 = vmatmul.f32.gmra.mxu1 %v3058_v35  ;;  %v3123_v17 = vld [vmem:[%s3459_s14] ss:$0 sm:$0xff] }
 0x32e   : > { %1301 = vmatmul.f32.gmra.mxu2 %v1189_v18 }
 0x32f   : > { %1390 = vmatmul.f32.gmra.mxu3 %v3114_v57 }
 0x332   : > { %v1212_v2 = vpop.f32.mrf.mxu3 }
 0x333   : > { %v1147_v13 = vpop.f32.mrf.mxu2 }
 0x334   : > { %v1213_v14 = vadd.f32 %v1212_v2, %v1147_v13  ;;  %1549 = vmatmul.f32.gmra.mxu1 %v3062_v37 }
 0x336   : > { %1304 = vmatmul.f32.gmra.mxu2 %v1192_v24 }
 0x33a   : > { %v1346_v5 = vpop.f32.mrf.mxu3 }
 0x33c   : > { %1552 = vmatmul.f32.gmra.mxu1 %v3066_v38 }
 0x33e   : > { %1307 = vmatmul.f32.gmra.mxu2 %v1195_v32 }
 0x342   : > { %v1349_v12 = vpop.f32.mrf.mxu3 }
 0x344   : > { %1555 = vmatmul.f32.gmra.mxu1 %v3070_v42 }
 0x346   : > { %1310 = vmatmul.f32.gmra.mxu2 %v1198_v47 }
 0x34a   : > { %v1352_v15 = vpop.f32.mrf.mxu3 }
 0x34c   : > { %1558 = vmatmul.f32.gmra.mxu1 %v3074_v46 }
 0x34e   : > { %1313 = vmatmul.f32.gmra.mxu2 %v1201_v56 }
 0x352   : > { %v1355_v16 = vpop.f32.mrf.mxu3 }
 0x354   : > { %1561 = vmatmul.f32.gmra.mxu1 %v3078_v50 }
 0x356   : > { %1316 = vmatmul.f32.gmra.mxu2 %v1204_v3 }
 0x35a   : > { %v1358_v22 = vpop.f32.mrf.mxu3 }
 0x35c   : > { %1564 = vmatmul.f32.gmra.mxu1 %v3082_v53 }
 0x35e   : > { %1319 = vmatmul.f32.gmra.mxu2 %v1207_v6 }
 0x362   : > { %v1361_v38 = vpop.f32.mrf.mxu3 }
 0x364   : > { %1567 = vmatmul.f32.gmra.mxu1 %v3086_v58 }
 0x366   : > { %1322 = vmatmul.f32.gmra.mxu2 %v1210_v11 }
 0x36a   : > { %v1364_v32 = vpop.f32.mrf.mxu3 }
 0x36c   : > { %1570 = vmatmul.f32.gmra.mxu1 %v3090_v63 }
 0x36e   : > { %1325 = vmatmul.f32.gmra.mxu2 %v1213_v14 }
 0x372   : > { %v1367_v44 = vpop.f32.mrf.mxu3 }
 0x374   : > { %1573 = vmatmul.f32.gmra.mxu1 %v3094_v9 }
 0x379   : > { %v1281_v34 = vpop.f32.mrf.mxu2 }
 0x37a   : > { %v1347_v18 = vadd.f32 %v1346_v5, %v1281_v34  ;;  %v1370_v51 = vpop.f32.mrf.mxu3 }
 0x37c   : > { %v1398_v20 = vadd.f32 %v3123_v17, %v1347_v18  ;;  %1576 = vmatmul.f32.gmra.mxu1 %v3098_v19 }
 0x37e   : > { %v1414_v21 = vmax.f32 %v1398_v20, 0.0 }
 0x380   : > { %1478 = vmatmul.f32.vlgmr.msrb.gmra.mxu0 %v1414_v21 }
 0x381   : > { %v1284_v35 = vpop.f32.mrf.mxu2 }
 0x382   : > { %v1350_v23 = vadd.f32 %v1349_v12, %v1284_v35  ;;  %v1373_v58 = vpop.f32.mrf.mxu3 }
 0x384   : > { %v1399_v37 = vadd.f32 %v3123_v17, %v1350_v23  ;;  %1579 = vmatmul.f32.gmra.mxu1 %v3102_v27 }
 0x386   : > { %v1415_v24 = vmax.f32 %v1399_v37, 0.0 }
 0x388   : > { %1481 = vmatmul.f32.gmra.mxu0 %v1415_v24 }
 0x389   : > { %v1287_v25 = vpop.f32.mrf.mxu2 }
 0x38a   : > { %v1353_v26 = vadd.f32 %v1352_v15, %v1287_v25  ;;  %v1376_v0 = vpop.f32.mrf.mxu3 }
 0x38c   : > { %v1400_v28 = vadd.f32 %v3123_v17, %v1353_v26  ;;  %1582 = vmatmul.f32.gmra.mxu1 %v3106_v39 }
 0x38e   : > { %v1416_v29 = vmax.f32 %v1400_v28, 0.0 }
 0x390   : > { %1484 = vmatmul.f32.gmra.mxu0 %v1416_v29 }
 0x391   : > { %v1290_v30 = vpop.f32.mrf.mxu2 }
 0x392   : > { %v1356_v42 = vadd.f32 %v1355_v16, %v1290_v30  ;;  %v1379_v5 = vpop.f32.mrf.mxu3 }
 0x394   : > { %v1401_v31 = vadd.f32 %v3123_v17, %v1356_v42  ;;  %1585 = vmatmul.f32.gmra.mxu1 %v3110_v48 }
 0x396   : > { %v1417_v33 = vmax.f32 %v1401_v31, 0.0 }
 0x398   : > { %1487 = vmatmul.f32.gmra.mxu0 %v1417_v33 }
 0x399   : > { %v1293_v40 = vpop.f32.mrf.mxu2 }
 0x39a   : > { %v1359_v46 = vadd.f32 %v1358_v22, %v1293_v40  ;;  %v1382_v11 = vpop.f32.mrf.mxu3 }
 0x39c   : > { %v1402_v41 = vadd.f32 %v3123_v17, %v1359_v46  ;;  %1588 = vmatmul.f32.gmra.mxu1 %v3114_v57 }
 0x39e   : > { %v1418_v43 = vmax.f32 %v1402_v41, 0.0 }
 0x3a0   : > { %1490 = vmatmul.f32.gmra.mxu0 %v1418_v43 }
 0x3a1   : > { %v1296_v45 = vpop.f32.mrf.mxu2  ;;  %v1544_v34 = vpop.f32.mrf.mxu1 }
 0x3a2   : > { %v1362_v50 = vadd.f32 %v1361_v38, %v1296_v45  ;;  %v1385_v39 = vpop.f32.mrf.mxu3 }
 0x3a4   : > { %v1403_v47 = vadd.f32 %v3123_v17, %v1362_v50 }
 0x3a6   : > { %v1419_v49 = vmax.f32 %v1403_v47, 0.0 }
 0x3a8   : > { %1493 = vmatmul.f32.gmra.mxu0 %v1419_v49 }
 0x3a9   : > { %v1299_v36 = vpop.f32.mrf.mxu2  ;;  %v1547_v23 = vpop.f32.mrf.mxu1 }
 0x3aa   : > { %v1365_v53 = vadd.f32 %v1364_v32, %v1299_v36  ;;  %v1388_v35 = vpop.f32.mrf.mxu3  ;;  %v3157_v32 = vld [vmem:[%s3460_s11] ss:$0 sm:$0xff] }
 0x3ac   : > { %v1404_v52 = vadd.f32 %v3123_v17, %v1365_v53 }
 0x3ae   : > { %v1420_v54 = vmax.f32 %v1404_v52, 0.0 }
 0x3b0   : > { %1496 = vmatmul.f32.gmra.mxu0 %v1420_v54 }
 0x3b1   : > { %v1302_v55 = vpop.f32.mrf.mxu2  ;;  %v1550_v28 = vpop.f32.mrf.mxu1 }
 0x3b2   : > { %v1368_v56 = vadd.f32 %v1367_v44, %v1302_v55  ;;  %v1391_v26 = vpop.f32.mrf.mxu3 }
 0x3b4   : > { %v1405_v59 = vadd.f32 %v3123_v17, %v1368_v56 }
 0x3b6   : > { %v1421_v60 = vmax.f32 %v1405_v59, 0.0 }
 0x3b8   : > { %1499 = vmatmul.f32.gmra.mxu0 %v1421_v60 }
 0x3b9   : > { %v1305_v61 = vpop.f32.mrf.mxu2  ;;  %v1553_v31 = vpop.f32.mrf.mxu1 }
 0x3ba   : > { %v1371_v63 = vadd.f32 %v1370_v51, %v1305_v61 }
 0x3bc   : > { %v1406_v62 = vadd.f32 %v3123_v17, %v1371_v63 }
 0x3be   : > { %v1422_v1 = vmax.f32 %v1406_v62, 0.0 }
 0x3c0   : > { %1502 = vmatmul.f32.gmra.mxu0 %v1422_v1 }
 0x3c1   : > { %v1308_v2 = vpop.f32.mrf.mxu2  ;;  %v1556_v41 = vpop.f32.mrf.mxu1 }
 0x3c2   : > { %v1374_v9 = vadd.f32 %v1373_v58, %v1308_v2 }
 0x3c4   : > { %v1407_v3 = vadd.f32 %v3123_v17, %v1374_v9 }
 0x3c6   : > { %v1423_v4 = vmax.f32 %v1407_v3, 0.0 }
 0x3c8   : > { %1505 = vmatmul.f32.gmra.mxu0 %v1423_v4 }
 0x3c9   : > { %v1311_v6 = vpop.f32.mrf.mxu2  ;;  %v1559_v47 = vpop.f32.mrf.mxu1 }
 0x3ca   : > { %v1377_v19 = vadd.f32 %v1376_v0, %v1311_v6 }
 0x3cc   : > { %v1408_v7 = vadd.f32 %v3123_v17, %v1377_v19 }
 0x3ce   : > { %v1424_v8 = vmax.f32 %v1408_v7, 0.0 }
 0x3d0   : > { %1508 = vmatmul.f32.gmra.mxu0 %v1424_v8 }
 0x3d1   : > { %v1314_v10 = vpop.f32.mrf.mxu2  ;;  %v1562_v52 = vpop.f32.mrf.mxu1 }
 0x3d2   : > { %v1380_v27 = vadd.f32 %v1379_v5, %v1314_v10 }
 0x3d4   : > { %v1409_v12 = vadd.f32 %v3123_v17, %v1380_v27 }
 0x3d6   : > { %v1425_v13 = vmax.f32 %v1409_v12, 0.0 }
 0x3d8   : > { %1511 = vmatmul.f32.gmra.mxu0 %v1425_v13 }
 0x3d9   : > { %v1317_v14 = vpop.f32.mrf.mxu2  ;;  %v1565_v58 = vpop.f32.mrf.mxu1 }
 0x3da   : > { %v1383_v15 = vadd.f32 %v1382_v11, %v1317_v14 }
 0x3dc   : > { %v1410_v16 = vadd.f32 %v3123_v17, %v1383_v15 }
 0x3de   : > { %v1426_v18 = vmax.f32 %v1410_v16, 0.0 }
 0x3e0   : > { %1514 = vmatmul.f32.gmra.mxu0 %v1426_v18 }
 0x3e1   : > { %v1320_v20 = vpop.f32.mrf.mxu2  ;;  %v1568_v62 = vpop.f32.mrf.mxu1 }
 0x3e2   : > { %v1386_v21 = vadd.f32 %v1385_v39, %v1320_v20 }
 0x3e4   : > { %v1411_v48 = vadd.f32 %v3123_v17, %v1386_v21 }
 0x3e6   : > { %v1427_v22 = vmax.f32 %v1411_v48, 0.0 }
 0x3e8   : > { %1517 = vmatmul.f32.gmra.mxu0 %v1427_v22 }
 0x3e9   : > { %v1323_v37 = vpop.f32.mrf.mxu2  ;;  %v1571_v3 = vpop.f32.mrf.mxu1 }
 0x3ea   : > { %v1389_v24 = vadd.f32 %v1388_v35, %v1323_v37 }
 0x3ec   : > { %v1412_v57 = vadd.f32 %v3123_v17, %v1389_v24 }
 0x3ee   : > { %v1428_v25 = vmax.f32 %v1412_v57, 0.0 }
 0x3f0   : > { %1520 = vmatmul.f32.gmra.mxu0 %v1428_v25 }
 0x3f1   : > { %v1326_v38 = vpop.f32.mrf.mxu2  ;;  %v1574_v7 = vpop.f32.mrf.mxu1 }
 0x3f2   : > { %v1392_v29 = vadd.f32 %v1391_v26, %v1326_v38 }
 0x3f4   : > { %v1413_v30 = vadd.f32 %v3123_v17, %v1392_v29 }
 0x3f6   : > { %v1429_v42 = vmax.f32 %v1413_v30, 0.0 }
 0x3f8   : > { %1523 = vmatmul.f32.gmra.mxu0 %v1429_v42 }
 0x3f9   : > { %v1577_v27 = vpop.f32.mrf.mxu1 }
 0x3fd   : > { %v1479_v33 = vpop.f32.mrf.mxu0 }
 0x3fe   : > { %v1545_v40 = vadd.f32 %v1544_v34, %v1479_v33 }
 0x400   : > { %v3160_v46 = vadd.f32 %v3157_v32, %v1545_v40 }
 0x401   : > { %v1580_v39 = vpop.f32.mrf.mxu1 }
 0x402   : > { %1613 = vst [vmem:[%s3163_s13] sm:$0xff] %v3160_v46 }
 0x405   : > { %v1482_v17 = vpop.f32.mrf.mxu0 }
 0x406   : > { %v1548_v43 = vadd.f32 %v1547_v23, %v1482_v17 }
 0x408   : > { %v3168_v44 = vadd.f32 %v3157_v32, %v1548_v43 }
 0x409   : > { %v1583_v21 = vpop.f32.mrf.mxu1 }
 0x40a   : > { %1614 = vst [vmem:[%s3163_s13 + $0x8] sm:$0xff] %v3168_v44 }
 0x40d   : > { %v1485_v45 = vpop.f32.mrf.mxu0 }
 0x40e   : > { %v1551_v50 = vadd.f32 %v1550_v28, %v1485_v45 }
 0x410   : > { %v3173_v49 = vadd.f32 %v3157_v32, %v1551_v50 }
 0x411   : > { %v1586_v37 = vpop.f32.mrf.mxu1 }
 0x412   : > { %1615 = vst [vmem:[%s3163_s13 + $0x10] sm:$0xff] %v3173_v49 }
 0x415   : > { %v1488_v36 = vpop.f32.mrf.mxu0 }
 0x416   : > { %v1554_v51 = vadd.f32 %v1553_v31, %v1488_v36 }
 0x418   : > { %v3178_v53 = vadd.f32 %v3157_v32, %v1554_v51 }
 0x419   : > { %v1589_v26 = vpop.f32.mrf.mxu1 }
 0x41a   : > { %1616 = vst [vmem:[%s3163_s13 + $0x18] sm:$0xff] %v3178_v53 }
 0x41d   : > { %v1491_v54 = vpop.f32.mrf.mxu0 }
 0x41e   : > { %v1557_v55 = vadd.f32 %v1556_v41, %v1491_v54 }
 0x420   : > { %v3183_v56 = vadd.f32 %v3157_v32, %v1557_v55 }
 0x422   : > { %1617 = vst [vmem:[%s3163_s13 + $0x20] sm:$0xff] %v3183_v56 }
 0x425   : > { %v1494_v59 = vpop.f32.mrf.mxu0 }
 0x426   : > { %v1560_v60 = vadd.f32 %v1559_v47, %v1494_v59 }
 0x428   : > { %v3188_v61 = vadd.f32 %v3157_v32, %v1560_v60 }
 0x42a   : > { %1618 = vst [vmem:[%s3163_s13 + $0x28] sm:$0xff] %v3188_v61 }
 0x42d   : > { %v1497_v63 = vpop.f32.mrf.mxu0 }
 0x42e   : > { %v1563_v0 = vadd.f32 %v1562_v52, %v1497_v63 }
 0x430   : > { %v3193_v1 = vadd.f32 %v3157_v32, %v1563_v0 }
 0x432   : > { %1619 = vst [vmem:[%s3163_s13 + $0x30] sm:$0xff] %v3193_v1 }
 0x435   : > { %v1500_v2 = vpop.f32.mrf.mxu0 }
 0x436   : > { %v1566_v9 = vadd.f32 %v1565_v58, %v1500_v2 }
 0x438   : > { %v3198_v4 = vadd.f32 %v3157_v32, %v1566_v9 }
 0x43a   : > { %1620 = vst [vmem:[%s3163_s13 + $0x38] sm:$0xff] %v3198_v4 }
 0x43d   : > { %v1503_v5 = vpop.f32.mrf.mxu0 }
 0x43e   : > { %v1569_v6 = vadd.f32 %v1568_v62, %v1503_v5 }
 0x440   : > { %v3203_v19 = vadd.f32 %v3157_v32, %v1569_v6 }
 0x442   : > { %1621 = vst [vmem:[%s3163_s13 + $0x40] sm:$0xff] %v3203_v19 }
 0x445   : > { %v1506_v8 = vpop.f32.mrf.mxu0 }
 0x446   : > { %v1572_v10 = vadd.f32 %v1571_v3, %v1506_v8 }
 0x448   : > { %v3208_v11 = vadd.f32 %v3157_v32, %v1572_v10 }
 0x44a   : > { %1622 = vst [vmem:[%s3163_s13 + $0x48] sm:$0xff] %v3208_v11 }
 0x44d   : > { %v1509_v12 = vpop.f32.mrf.mxu0 }
 0x44e   : > { %v1575_v13 = vadd.f32 %v1574_v7, %v1509_v12 }
 0x450   : > { %v3213_v14 = vadd.f32 %v3157_v32, %v1575_v13 }
 0x452   : > { %1623 = vst [vmem:[%s3163_s13 + $0x50] sm:$0xff] %v3213_v14 }
 0x455   : > { %v1512_v15 = vpop.f32.mrf.mxu0 }
 0x456   : > { %v1578_v16 = vadd.f32 %v1577_v27, %v1512_v15 }
 0x458   : > { %v3218_v34 = vadd.f32 %v3157_v32, %v1578_v16 }
 0x45a   : > { %1624 = vst [vmem:[%s3163_s13 + $0x58] sm:$0xff] %v3218_v34 }
 0x45d   : > { %v1515_v18 = vpop.f32.mrf.mxu0 }
 0x45e   : > { %v1581_v20 = vadd.f32 %v1580_v39, %v1515_v18 }
 0x460   : > { %v3223_v48 = vadd.f32 %v3157_v32, %v1581_v20 }
 0x462   : > { %1625 = vst [vmem:[%s3163_s13 + $0x60] sm:$0xff] %v3223_v48 }
 0x465   : > { %v1518_v35 = vpop.f32.mrf.mxu0 }
 0x466   : > { %v1584_v22 = vadd.f32 %v1583_v21, %v1518_v35 }
 0x468   : > { %v3228_v23 = vadd.f32 %v3157_v32, %v1584_v22 }
 0x46a   : > { %1626 = vst [vmem:[%s3163_s13 + $0x68] sm:$0xff] %v3228_v23 }
 0x46d   : > { %v1521_v24 = vpop.f32.mrf.mxu0 }
 0x46e   : > { %v1587_v57 = vadd.f32 %v1586_v37, %v1521_v24 }
 0x470   : > { %v3233_v25 = vadd.f32 %v3157_v32, %v1587_v57 }
 0x472   : > { %1627 = vst [vmem:[%s3163_s13 + $0x70] sm:$0xff] %v3233_v25 }
 0x475   : > { %v1524_v38 = vpop.f32.mrf.mxu0 }
 0x476   : > { %v1590_v28 = vadd.f32 %v1589_v26, %v1524_v38  ;;  %1631 = sbr.rel (%p1952_p11) target bundleno = 1163 (0x48b), region = 116 }
 0x478   : > { %v3238_v29 = vadd.f32 %v3157_v32, %v1590_v28 }
 0x47a   : > { %1628 = vst [vmem:[%s3163_s13 + $0x78] sm:$0xff] %v3238_v29 }
 0x47b   : > { %1633 = vst [vmem:[%s1632_s3] sm:$0xff] %v3160_v46 }
 0x47c   : > { %1634 = vst [vmem:[%s1632_s3 + $0x8] sm:$0xff] %v3168_v44 }
 0x47d   : > { %1635 = vst [vmem:[%s1632_s3 + $0x10] sm:$0xff] %v3173_v49 }
 0x47e   : > { %1636 = vst [vmem:[%s1632_s3 + $0x18] sm:$0xff] %v3178_v53 }
 0x47f   : > { %1637 = vst [vmem:[%s1632_s3 + $0x20] sm:$0xff] %v3183_v56 }
 0x480   : > { %1638 = vst [vmem:[%s1632_s3 + $0x28] sm:$0xff] %v3188_v61 }
 0x481   : > { %1639 = vst [vmem:[%s1632_s3 + $0x30] sm:$0xff] %v3193_v1 }
 0x482   : > { %1640 = vst [vmem:[%s1632_s3 + $0x38] sm:$0xff] %v3198_v4 }
 0x483   : > { %1641 = vst [vmem:[%s1632_s3 + $0x40] sm:$0xff] %v3203_v19 }
 0x484   : > { %1642 = vst [vmem:[%s1632_s3 + $0x48] sm:$0xff] %v3208_v11 }
 0x485   : > { %1643 = vst [vmem:[%s1632_s3 + $0x50] sm:$0xff] %v3213_v14 }
 0x486   : > { %1644 = vst [vmem:[%s1632_s3 + $0x58] sm:$0xff] %v3218_v34 }
 0x487   : > { %1645 = vst [vmem:[%s1632_s3 + $0x60] sm:$0xff] %v3223_v48 }
 0x488   : > { %1646 = vst [vmem:[%s1632_s3 + $0x68] sm:$0xff] %v3228_v23 }
 0x489   : > { %1647 = vst [vmem:[%s1632_s3 + $0x70] sm:$0xff] %v3233_v25 }
 0x48a   : > { %1648 = vst [vmem:[%s1632_s3 + $0x78] sm:$0xff] %v3238_v29 }
 0x48b PF: > { %s3462_s6 = sld [smem:[#allocation31_spill]] }
 0x491   : > { %p1953_p3 = scmp.le.s32.totalorder %s3462_s6, 0 }
 0x492   : > { %s3262_s23 = scalar_lea.vmem (!%p1953_p3), [#allocation4], %s2878_s25 }
 0x493   : > { %1652 = sbr.rel (%p1953_p3) target bundleno = 1195 (0x4ab), region = 120 }
 0x498   : > { %v1654_v30 = vld [vmem:[%s3262_s23] sm:$0xff]  ;;  %v1655_v42 = vld [vmem:[%s3262_s23 + $0x8] sm:$0xff]  ;;  %v1656_v31 = vld [vmem:[%s3262_s23 + $0x10] sm:$0xff] }
 0x499   : > { %v1670_v32 = vadd.f32 %v1654_v30, %v3160_v46  ;;  %v1671_v33 = vadd.f32 %v1655_v42, %v3168_v44  ;;  %v1672_v40 = vadd.f32 %v1656_v31, %v3173_v49  ;;  %v1657_v17 = vld [vmem:[%s3262_s23 + $0x18] sm:$0xff]  ;;  %v1658_v41 = vld [vmem:[%s3262_s23 + $0x20] sm:$0xff]  ;;  %v1659_v43 = vld [vmem:[%s3262_s23 + $0x28] sm:$0xff] }
 0x49a   : > { %v1673_v45 = vadd.f32 %v1657_v17, %v3178_v53  ;;  %v1660_v50 = vld [vmem:[%s3262_s23 + $0x30] sm:$0xff]  ;;  %v1674_v47 = vadd.f32 %v1658_v41, %v3183_v56  ;;  %v1661_v46 = vld [vmem:[%s3262_s23 + $0x38] sm:$0xff]  ;;  %v1675_v44 = vadd.f32 %v1659_v43, %v3188_v61  ;;  %v1662_v49 = vld [vmem:[%s3262_s23 + $0x40] sm:$0xff] }
 0x49b   : > { %1686 = vst [vmem:[%s3262_s23] sm:$0xff] %v1670_v32  ;;  %v1676_v36 = vadd.f32 %v1660_v50, %v3193_v1  ;;  %v1663_v51 = vld [vmem:[%s3262_s23 + $0x48] sm:$0xff]  ;;  %v1677_v53 = vadd.f32 %v1661_v46, %v3198_v4  ;;  %v1664_v52 = vld [vmem:[%s3262_s23 + $0x50] sm:$0xff]  ;;  %v1678_v54 = vadd.f32 %v1662_v49, %v3203_v19  ;;  %v1665_v55 = vld [vmem:[%s3262_s23 + $0x58] sm:$0xff] }
 0x49c   : > { %1687 = vst [vmem:[%s3262_s23 + $0x8] sm:$0xff] %v1671_v33  ;;  %v1679_v56 = vadd.f32 %v1663_v51, %v3208_v11  ;;  %v1666_v58 = vld [vmem:[%s3262_s23 + $0x60] sm:$0xff]  ;;  %v1680_v59 = vadd.f32 %v1664_v52, %v3213_v14  ;;  %v1667_v60 = vld [vmem:[%s3262_s23 + $0x68] sm:$0xff]  ;;  %v1681_v61 = vadd.f32 %v1665_v55, %v3218_v34  ;;  %v1668_v63 = vld [vmem:[%s3262_s23 + $0x70] sm:$0xff] }
 0x49d   : > { %1688 = vst [vmem:[%s3262_s23 + $0x10] sm:$0xff] %v1672_v40  ;;  %v1682_v62 = vadd.f32 %v1666_v58, %v3223_v48  ;;  %v1669_v0 = vld [vmem:[%s3262_s23 + $0x78] sm:$0xff]  ;;  %v1683_v1 = vadd.f32 %v1667_v60, %v3228_v23  ;;  %v1684_v2 = vadd.f32 %v1668_v63, %v3233_v25 }
 0x49e   : > { %1689 = vst [vmem:[%s3262_s23 + $0x18] sm:$0xff] %v1673_v45  ;;  %v1685_v9 = vadd.f32 %v1669_v0, %v3238_v29 }
 0x49f   : > { %1690 = vst [vmem:[%s3262_s23 + $0x20] sm:$0xff] %v1674_v47 }
 0x4a0   : > { %1691 = vst [vmem:[%s3262_s23 + $0x28] sm:$0xff] %v1675_v44 }
 0x4a1   : > { %1692 = vst [vmem:[%s3262_s23 + $0x30] sm:$0xff] %v1676_v36 }
 0x4a2   : > { %1693 = vst [vmem:[%s3262_s23 + $0x38] sm:$0xff] %v1677_v53 }
 0x4a3   : > { %1694 = vst [vmem:[%s3262_s23 + $0x40] sm:$0xff] %v1678_v54 }
 0x4a4   : > { %1695 = vst [vmem:[%s3262_s23 + $0x48] sm:$0xff] %v1679_v56 }
 0x4a5   : > { %1696 = vst [vmem:[%s3262_s23 + $0x50] sm:$0xff] %v1680_v59 }
 0x4a6   : > { %1697 = vst [vmem:[%s3262_s23 + $0x58] sm:$0xff] %v1681_v61 }
 0x4a7   : > { %1698 = vst [vmem:[%s3262_s23 + $0x60] sm:$0xff] %v1682_v62 }
 0x4a8   : > { %1699 = vst [vmem:[%s3262_s23 + $0x68] sm:$0xff] %v1683_v1 }
 0x4a9   : > { %1700 = vst [vmem:[%s3262_s23 + $0x70] sm:$0xff] %v1684_v2 }
 0x4aa   : > { %1701 = vst [vmem:[%s3262_s23 + $0x78] sm:$0xff] %v1685_v9 }
 0x4ab PF: > { %s1702_s8 = scalar_lea.vmem [#allocation4], %s2878_s25 }
 0x4b1   : > { %v1703_v3 = vld [vmem:[%s1702_s8] sm:$0xff]  ;;  %v1704_v4 = vld [vmem:[%s1702_s8 + $0x8] sm:$0xff]  ;;  %v1705_v5 = vld [vmem:[%s1702_s8 + $0x10] sm:$0xff] }
 0x4b2   : > { %1719 = vst [vmem:[%s2888_s24] sm:$0xff] %v1703_v3  ;;  %v1706_v6 = vld [vmem:[%s1702_s8 + $0x18] sm:$0xff]  ;;  %v1707_v19 = vld [vmem:[%s1702_s8 + $0x20] sm:$0xff]  ;;  %v1708_v7 = vld [vmem:[%s1702_s8 + $0x28] sm:$0xff] }
 0x4b3   : > { %1720 = vst [vmem:[%s2888_s24 + $0x8] sm:$0xff] %v1704_v4  ;;  %v1709_v8 = vld [vmem:[%s1702_s8 + $0x30] sm:$0xff]  ;;  %v1710_v10 = vld [vmem:[%s1702_s8 + $0x38] sm:$0xff]  ;;  %v1711_v11 = vld [vmem:[%s1702_s8 + $0x40] sm:$0xff] }
 0x4b4   : > { %1721 = vst [vmem:[%s2888_s24 + $0x10] sm:$0xff] %v1705_v5  ;;  %v1712_v27 = vld [vmem:[%s1702_s8 + $0x48] sm:$0xff]  ;;  %v1713_v12 = vld [vmem:[%s1702_s8 + $0x50] sm:$0xff]  ;;  %v1714_v13 = vld [vmem:[%s1702_s8 + $0x58] sm:$0xff] }
 0x4b5   : > { %1722 = vst [vmem:[%s2888_s24 + $0x18] sm:$0xff] %v1706_v6  ;;  %v1715_v14 = vld [vmem:[%s1702_s8 + $0x60] sm:$0xff]  ;;  %v1716_v15 = vld [vmem:[%s1702_s8 + $0x68] sm:$0xff]  ;;  %v1717_v39 = vld [vmem:[%s1702_s8 + $0x70] sm:$0xff] }
 0x4b6   : > { %1723 = vst [vmem:[%s2888_s24 + $0x20] sm:$0xff] %v1707_v19  ;;  %v1718_v16 = vld [vmem:[%s1702_s8 + $0x78] sm:$0xff] }
 0x4b7   : > { %1724 = vst [vmem:[%s2888_s24 + $0x28] sm:$0xff] %v1708_v7 }
 0x4b8   : > { %1725 = vst [vmem:[%s2888_s24 + $0x30] sm:$0xff] %v1709_v8 }
 0x4b9   : > { %1726 = vst [vmem:[%s2888_s24 + $0x38] sm:$0xff] %v1710_v10 }
 0x4ba   : > { %1727 = vst [vmem:[%s2888_s24 + $0x40] sm:$0xff] %v1711_v11 }
 0x4bb   : > { %1728 = vst [vmem:[%s2888_s24 + $0x48] sm:$0xff] %v1712_v27 }
 0x4bc   : > { %1729 = vst [vmem:[%s2888_s24 + $0x50] sm:$0xff] %v1713_v12 }
 0x4bd   : > { %1730 = vst [vmem:[%s2888_s24 + $0x58] sm:$0xff] %v1714_v13 }
 0x4be   : > { %1731 = vst [vmem:[%s2888_s24 + $0x60] sm:$0xff] %v1715_v14 }
 0x4bf   : > { %1732 = vst [vmem:[%s2888_s24 + $0x68] sm:$0xff] %v1716_v15 }
 0x4c0   : > { %1733 = vst [vmem:[%s2888_s24 + $0x70] sm:$0xff] %v1717_v39 }
 0x4c1   : > { %1734 = vst [vmem:[%s2888_s24 + $0x78] sm:$0xff] %v1718_v16 }
 0x4c2 PF: > { %s3463_s15 = sld [smem:[#allocation48_spill]]  ;;  %s1748_s30 = sshll.u32 %s2888_s24, 4  ;;  %s1749_s30 = int_to_ptr.vmem [resolvable:$true] %s1748_s30 }
 0x4c3   : > { %s1736_s14 = scalar_lea.sflag [#allocation8], %s501_s27 }
 0x4c8   : > { %s1747_s0 = scalar_lea.hbm %s3463_s15, %s2878_s25  ;;  %s2447_s4 = scalar_lea.hbm %s3463_s15, 256 }
 0x4c9   : > { %s1750_s2 = sshll.u32 %s1747_s0, 4  ;;  %s1751_s2 = int_to_ptr.hbm [resolvable:$true] %s1750_s2 }
 0x4ca   : > { %s2441_s12 = sshra.s32 %s1751_s2, 4  ;;  %s2442_s12 = int_to_ptr.hbm [resolvable:$true] %s2441_s12 }
 0x4cb   : > { %s2443_s5 = scalar_lea.hbm %s2442_s12, 128  ;;  %p2448_p1 = scmp.lt.s32.totalorder %s2442_s12, %s3463_s15 }
 0x4cc   : > { %p2444_p12 = scmp.ne.s32.totalorder %s2442_s12, %s2443_s5  ;;  %p2449_p2 = scmp.lt.s32.totalorder %s2447_s4, %s2443_s5 }
 0x4ce   : > { %p2445_p13 = pnand %p2444_p12, %p2833_p6  ;;  %p2450_p4 = por %p2449_p2, %p2448_p1 }
 0x4d0   : > { %p2446_p0 = pneg %p2445_p13 }
 0x4d2   : > { %p2451_p5 = pnand %p2450_p4, %p2446_p0 }
 0x4d4   : > { %2454 = shalt.err (!%p2451_p5)
}
 0x4d5   : > { %s2595_s27 = smov 128   ;;  %s2596_s25 = smov 8  }
 0x4d6   : > { %2023 = dma.vmem_to_hbm [thread:$0]  (%p2833_p6), %s1749_s30, 2048, %s1751_s2, %s1736_s14, %s2595_s27, %s2595_s27, %s2596_s25  }
 0x4d7 PF: > { %p2065_p7 = scmp.ge.s32.totalorder %s2581_s29, 2  ;;  %s1765_s24 = sand.u32 1, %s2533_s17  }
 0x4d8   : > { %s1766_s23 = scalar_lea.sflag [#allocation8], %s1765_s24 }
 0x4d9   : > { %p2049_p8 = pnand %p2065_p7, %p2842_p10 }
 0x4db   : > { %p2050_p9 = pneg %p2049_p8 }
 0x4dd   : > { %2528 = dma.done.wait (%p2050_p9), %s1766_s23, 2048  }
 0x4de   : > { %2530 = vsyncadd (%p2050_p9), %s1766_s23, 4294965248  ;;  %s30_s29 = sadd.s32 1, %s2581_s29   ;;  %s3465_s23 = sld [smem:[#allocation32_spill]] }
 0x4df   : > { %p3351_p11 = scmp.ge.s32.totalorder %s30_s29, 14   ;;  %s3466_s24 = sld [smem:[#allocation33_spill]] }
 0x4e0   : > { %s3467_s26 = sld [smem:[#allocation35_spill]]  ;;  %s3470_s17 = smov %s2537_s18 }
 0x4e1   : > { %s3468_s27 = sld [smem:[#allocation36_spill]]  ;;  %s3471_s18 = smov %s2541_s19 }
 0x4e2   : > { %s3469_s7 = sld [smem:[#allocation37_spill]]  ;;  %s3472_s19 = smov %s2821_s20 }
 0x4e3   : > { %s3473_s20 = smov %s2549_s21  ;;  %s3474_s21 = smov %s2553_s22 }
 0x4e4   : > { %s3475_s22 = smov %s2840_s10  ;;  %s3476_s25 = smov %s2577_s28 }
 0x4e5   :  { %29 = sbr.rel (!%p3351_p11) target bundleno = 25 (0x19), region = 169 }
 0x4e8   : > { %s3477_s28 = smov %s3469_s7 }
 0x4ea   :  { %1772 = vsyncpa [#allocation7], 1 }
 0x4eb   :  { %1774 = vsyncpa [#allocation7 + $0x1], 1 }
 0x4ec   :  { %1775 = vsyncpa [#allocation10], 1 }
 0x4ed   :  { %1776 = vsyncpa [#allocation13], 1 }
 0x4ee   :  { %1777 = vsyncpa [#allocation16], 1 }
 0x4ef   :  { %1778 = vsyncpa [#allocation8], 1 }
 0x4f0   :  { %1780 = vsyncpa [#allocation8 + $0x1], 1 }
 0x4f1   :  { %1781 = vsyncmov [#allocation5] }
 0x4f4   :  { %s1782_s10 = vpop.sfrf %1781 }
 0x4f5   :  { %p1959_p6 = scmp.ne.s32.totalorder %s1782_s10, 0 }
 0x4f7   :  { %1786 = shalt.err (%p1959_p6)  }

</bundles_post_ra>
